<compile_context>
chip_gen: v7x
topology: tpu7x:2x2x1
jax: 0.10.0
libtpu: 0.0.40
codegen_flags: <defaults>
</compile_context>

<pallas_src>
import functools

import jax
import jax.numpy as jnp
from jax.experimental import pallas as pl
from jax.experimental.pallas import tpu as pltpu

NHOP = 5          # skeleton_graph = 4 -> adj + 4 extended adjacencies
BN_EPS = 1e-5


# ---------------------------------------------------------------------------
# Pallas kernel: full _ResGraphConv forward for one batch TILE (BT elements).
#   residual + ReLU(affine2(gconv2( ReLU(affine1(gconv1(x))) )))
# All heavy preprocessing (eye mask, Lamda prefix products, diag collapse, BN fold)
# was hoisted into the wrapper; the kernel does matmuls + a short VPU epilogue.
# ---------------------------------------------------------------------------
def _res_graph_conv_kernel(bt, j,
                           x_ref, adj_ref,
                           w0a_ref, w1a_ref, lama_ref, deffa_ref, sca_ref, sha_ref,
                           w0b_ref, w1b_ref, lamb_ref, deffb_ref, scb_ref, shb_ref,
                           out_ref):
    x = x_ref[...]                 # (BT*J, Din)   float32
    adj_off = adj_ref[...]         # (NHOP*J, J)   off-diagonal hops, row-stacked
    cdt = adj_off.dtype            # MXU operand dtype (float32 or bfloat16)

    def layer(h, w0_ref, w1_ref, lam_ref, deff_ref, sc_ref, sh_ref):
        w0 = w0_ref[...]                               # (Fin, F)
        w1 = w1_ref[...]
        f = w0.shape[1]
        hc = h.astype(cdt)
        # Feature projections, batched over the whole tile (M = BT*J).
        # (Kept as two dots: F < 128 lanes, so a fused (Fin, 2F) weight would force a
        #  mid-lane-tile slice / relayout with no real MXU benefit at this size.)
        h0 = jnp.dot(hc, w0, preferred_element_type=jnp.float32)      # (BT*J, F)
        h1 = jnp.dot(hc, w1, preferred_element_type=jnp.float32)      # (BT*J, F)

        # Diagonal-hop contribution: sum_k lam_eff_k * diag(A_k) precollapsed into deff.
        acc = h0 * deff_ref[...]                                       # (BT*J, F) VPU

        # Off-diagonal hops: one stacked (NHOP*J, J) @ (J, F) matmul per batch element,
        # then a lam_eff-weighted reduction over the hop axis (VPU).
        h1c = h1.astype(cdt)
        lam = lam_ref[...]                                             # (NHOP, J, F) f32
        off = []
        for b in range(bt):                                            # static unroll
            hb = h1c[b * j:(b + 1) * j, :]                             # (J, F)
            agg = jnp.dot(adj_off, hb,
                          preferred_element_type=jnp.float32)          # (NHOP*J, F)
            off.append(jnp.sum(lam * agg.reshape(NHOP, j, f), axis=0))  # (J, F)
        acc = acc + jnp.concatenate(off, axis=0)                       # (BT*J, F)

        # Folded (gconv bias + eval-mode BatchNorm1d) affine, then ReLU — all f32.
        return jnp.maximum(acc * sc_ref[...] + sh_ref[...], 0.0)

    h = layer(x, w0a_ref, w1a_ref, lama_ref, deffa_ref, sca_ref, sha_ref)   # (BT*J, H)
    y = layer(h, w0b_ref, w1b_ref, lamb_ref, deffb_ref, scb_ref, shb_ref)   # (BT*J, Dout)
    out_ref[...] = x + y                                                    # residual


# ---------------------------------------------------------------------------
# Wrapper: batch-invariant parameter folding + pallas_call with a batch-tiled grid.
# ---------------------------------------------------------------------------
def _fold_layer(adj_diag, lam, bias, bn, w, bt, mxu_dtype):
    """Precompute batch-invariant per-layer tensors (hoisted out of the kernel)."""
    nhop, jj, f = lam.shape
    # lam_eff[k] = prod_{m<k}(1 - lam_m) * lam_k  (serial prefix chain removed from kernel)
    prefix = jnp.concatenate(
        [jnp.ones((1, jj, f), jnp.float32), jnp.cumprod(1.0 - lam[:-1], axis=0)], axis=0)
    lam_eff = prefix * lam                                         # (NHOP, J, F)
    # Entire diagonal-hop term collapsed to one (J, F) matrix, tiled over the batch tile.
    deff = jnp.sum(lam_eff * adj_diag[:, :, None], axis=0)         # (J, F)
    deff_tiled = jnp.tile(deff, (bt, 1))                           # (BT*J, F)
    # Fold gconv bias + eval-mode BatchNorm into scale / shift.
    gamma, beta, mean, var = bn[0], bn[1], bn[2], bn[3]            # each (1, F)
    scale = gamma * jax.lax.rsqrt(var + BN_EPS)                    # (1, F)
    shift = (bias - mean) * scale + beta                           # (1, F)
    w0 = w[0].astype(mxu_dtype)
    w1 = w[1].astype(mxu_dtype)
    return w0, w1, lam_eff, deff_tiled, scale, shift


def res_graph_conv(x, adj_stack, params, *, block_batch=8, mxu_dtype=jnp.float32):
    B, J, Din = x.shape
    H = params["w1"].shape[2]
    Dout = params["w2"].shape[2]
    nhop = adj_stack.shape[0]
    assert Din == Dout, "residual connection requires input_dim == output_dim"
    assert nhop == NHOP

    # Batch tile size: largest divisor of B that is <= block_batch.
    bt = min(block_batch, B)
    while B % bt:
        bt -= 1

    # Batch-invariant adjacency preprocessing (hoisted out of the kernel).
    eye = jnp.eye(J, dtype=jnp.float32)
    adj_diag = jnp.sum(adj_stack * eye, axis=2)                            # (NHOP, J)
    adj_off = (adj_stack * (1.0 - eye)).reshape(nhop * J, J).astype(mxu_dtype)

    l1 = _fold_layer(adj_diag, params["lam1"], params["b1"], params["bn1"],
                     params["w1"], bt, mxu_dtype)
    l2 = _fold_layer(adj_diag, params["lam2"], params["b2"], params["bn2"],
                     params["w2"], bt, mxu_dtype)

    x2 = x.reshape(B * J, Din).astype(jnp.float32)

    def _const(shape):
        return pl.BlockSpec(shape, lambda g: (0,) * len(shape))           # resident params

    kernel = functools.partial(_res_graph_conv_kernel, bt, J)

    out = pl.pallas_call(
        kernel,
        out_shape=jax.ShapeDtypeStruct((B * J, Dout), jnp.float32),
        grid=(B // bt,),
        in_specs=[
            pl.BlockSpec((bt * J, Din), lambda g: (g, 0)),                 # x tile
            _const((nhop * J, J)),                                         # off-diag adjacency
            # layer 1
            _const((Din, H)), _const((Din, H)),
            _const((nhop, J, H)), _const((bt * J, H)),
            _const((1, H)), _const((1, H)),
            # layer 2
            _const((H, Dout)), _const((H, Dout)),
            _const((nhop, J, Dout)), _const((bt * J, Dout)),
            _const((1, Dout)), _const((1, Dout)),
        ],
        out_specs=pl.BlockSpec((bt * J, Dout), lambda g: (g, 0)),
        compiler_params=pltpu.CompilerParams(dimension_semantics=("parallel",)),
    )(x2, adj_off, *l1, *l2)
    return out.reshape(B, J, Dout)


# ---------------------------------------------------------------------------
# Pure-JAX reference (mirrors the PyTorch forward, f32) for verification.
# ---------------------------------------------------------------------------
def _ref_forward(x, adj_stack, p):
    J = adj_stack.shape[1]
    E = jnp.eye(J, dtype=jnp.float32)

    def gconv_bn_relu(h_in, w, lam, bias, bn):
        h0 = jnp.matmul(h_in, w[0])
        h1 = jnp.matmul(h_in, w[1])
        acc = jnp.zeros_like(h0)
        prefix = jnp.ones_like(lam[0])
        for k in range(NHOP):
            a = adj_stack[k]
            wha = jnp.matmul(a * E, h0) + jnp.matmul(a * (1.0 - E), h1)
            acc = acc + prefix * (lam[k] * wha)
            prefix = prefix * (1.0 - lam[k])
        acc = acc + bias
        gamma, beta, mean, var = bn[0], bn[1], bn[2], bn[3]
        y = (acc - mean) * (gamma * jax.lax.rsqrt(var + BN_EPS)) + beta
        return jnp.maximum(y, 0.0)

    h = gconv_bn_relu(x, p["w1"], p["lam1"], p["b1"], p["bn1"])
    y = gconv_bn_relu(h, p["w2"], p["lam2"], p["b2"], p["bn2"])
    return x + y


# ---------------------------------------------------------------------------
# Deterministic parameter construction (shapes follow the module __init__).
# ---------------------------------------------------------------------------
def _make_layer_params(key, in_f, out_f, J):
    k = jax.random.split(key, 6)
    bound_w = 1.414 * jnp.sqrt(6.0 / (in_f * out_f + 2 * out_f))   # xavier_uniform, gain=1.414
    w = jax.random.uniform(k[0], (2, in_f, out_f), jnp.float32, -bound_w, bound_w)
    # Lamdas are init to ones in torch; perturb so every hop contributes in this test.
    lam = jax.random.uniform(k[1], (NHOP, J, out_f), jnp.float32, 0.5, 1.0)
    stdv = 1.0 / jnp.sqrt(out_f)
    b = jax.random.uniform(k[2], (1, out_f), jnp.float32, -stdv, stdv)
    gamma = jax.random.uniform(k[3], (1, out_f), jnp.float32, 0.8, 1.2)
    beta = jax.random.uniform(k[4], (1, out_f), jnp.float32, -0.1, 0.1)
    mean = jax.random.uniform(k[5], (1, out_f), jnp.float32, -0.1, 0.1)
    var = jnp.ones((1, out_f), jnp.float32) * 0.9
    bn = jnp.stack([gamma, beta, mean, var], axis=0)               # (4, 1, out_f)
    return w, lam, b, bn


if __name__ == "__main__":
    B, J = 16, 16          # batch (tiled 8 per grid step -> 2 parallel steps), joints
    Din = Dout = 32        # residual requires input_dim == output_dim
    H = 32                 # hid_dim

    key = jax.random.PRNGKey(0)
    kx, kadj, k1, k2 = jax.random.split(key, 4)

    x = jax.random.normal(kx, (B, J, Din), jnp.float32)

    # adj, adj_ext1..4 buffers + affinity-modulation params (init 1e-6), then
    # per-forward symmetrization (A.T + A) / 2 — done once here as glue.
    adj_raw = jax.random.uniform(kadj, (NHOP, J, J), jnp.float32, 0.0, 1.0)
    adj_mod = adj_raw + 1e-6
    adj_stack = (jnp.swapaxes(adj_mod, 1, 2) + adj_mod) * 0.5

    w1, lam1, b1, bn1 = _make_layer_params(k1, Din, H, J)
    w2, lam2, b2, bn2 = _make_layer_params(k2, H, Dout, J)
    params = dict(w1=w1, lam1=lam1, b1=b1, bn1=bn1,
                  w2=w2, lam2=lam2, b2=b2, bn2=bn2)

    ref = _ref_forward(x, adj_stack, params)

    # Exact-semantics run (f32 MXU operands).
    out = res_graph_conv(x, adj_stack, params, block_batch=8, mxu_dtype=jnp.float32)
    out = jax.block_until_ready(out)
    assert out.shape == (B, J, Dout)
    assert jnp.allclose(out, ref, rtol=1e-4, atol=1e-4), \
        f"f32 max abs err {jnp.max(jnp.abs(out - ref))}"

    # bf16 MXU-operand run (v6e / v7x fast path): f32 accumulation + f32 epilogue.
    out_bf16 = res_graph_conv(x, adj_stack, params, block_batch=8, mxu_dtype=jnp.bfloat16)
    out_bf16 = jax.block_until_ready(out_bf16)
    assert jnp.allclose(out_bf16, ref, rtol=5e-2, atol=5e-2), \
        f"bf16 max abs err {jnp.max(jnp.abs(out_bf16 - ref))}"

    print("KERNEL_OK")
</pallas_src>

<mosaic_0001>
module attributes {stable_mosaic.version = 11 : i64} {
  func.func @_res_graph_conv_kernel(%arg0: i32, %arg1: memref<128x32xf32, #tpu.memory_space<vmem>>, %arg2: memref<80x16xf32, #tpu.memory_space<vmem>>, %arg3: memref<32x32xf32, #tpu.memory_space<vmem>>, %arg4: memref<32x32xf32, #tpu.memory_space<vmem>>, %arg5: memref<5x16x32xf32, #tpu.memory_space<vmem>>, %arg6: memref<128x32xf32, #tpu.memory_space<vmem>>, %arg7: memref<1x32xf32, #tpu.memory_space<vmem>>, %arg8: memref<1x32xf32, #tpu.memory_space<vmem>>, %arg9: memref<32x32xf32, #tpu.memory_space<vmem>>, %arg10: memref<32x32xf32, #tpu.memory_space<vmem>>, %arg11: memref<5x16x32xf32, #tpu.memory_space<vmem>>, %arg12: memref<128x32xf32, #tpu.memory_space<vmem>>, %arg13: memref<1x32xf32, #tpu.memory_space<vmem>>, %arg14: memref<1x32xf32, #tpu.memory_space<vmem>>, %arg15: memref<128x32xf32, #tpu.memory_space<vmem>>) attributes {dimension_semantics = [#tpu.dimension_semantics<parallel>], iteration_bounds = array<i64: 2>, scalar_prefetch = 0 : i64, scratch_operands = 0 : i64, tpu.core_type = #tpu.core_type<tc>, window_params = [{transform_indices = @transform_0, window_bounds = array<i64: 128, 32>}, {pipeline_mode = #tpu.pipeline_mode<synchronous>, transform_indices = @transform_1, window_bounds = array<i64: 80, 16>}, {pipeline_mode = #tpu.pipeline_mode<synchronous>, transform_indices = @transform_2, window_bounds = array<i64: 32, 32>}, {pipeline_mode = #tpu.pipeline_mode<synchronous>, transform_indices = @transform_3, window_bounds = array<i64: 32, 32>}, {pipeline_mode = #tpu.pipeline_mode<synchronous>, transform_indices = @transform_4, window_bounds = array<i64: 5, 16, 32>}, {pipeline_mode = #tpu.pipeline_mode<synchronous>, transform_indices = @transform_5, window_bounds = array<i64: 128, 32>}, {pipeline_mode = #tpu.pipeline_mode<synchronous>, transform_indices = @transform_6, window_bounds = array<i64: 1, 32>}, {pipeline_mode = #tpu.pipeline_mode<synchronous>, transform_indices = @transform_7, window_bounds = array<i64: 1, 32>}, {pipeline_mode = #tpu.pipeline_mode<synchronous>, transform_indices = @transform_8, window_bounds = array<i64: 32, 32>}, {pipeline_mode = #tpu.pipeline_mode<synchronous>, transform_indices = @transform_9, window_bounds = array<i64: 32, 32>}, {pipeline_mode = #tpu.pipeline_mode<synchronous>, transform_indices = @transform_10, window_bounds = array<i64: 5, 16, 32>}, {pipeline_mode = #tpu.pipeline_mode<synchronous>, transform_indices = @transform_11, window_bounds = array<i64: 128, 32>}, {pipeline_mode = #tpu.pipeline_mode<synchronous>, transform_indices = @transform_12, window_bounds = array<i64: 1, 32>}, {pipeline_mode = #tpu.pipeline_mode<synchronous>, transform_indices = @transform_13, window_bounds = array<i64: 1, 32>}, {transform_indices = @transform_14, window_bounds = array<i64: 128, 32>}]} {
    %c0 = arith.constant 0 : index
    %c0_0 = arith.constant 0 : index
    %0 = vector.load %arg1[%c0, %c0_0] : memref<128x32xf32, #tpu.memory_space<vmem>>, vector<128x32xf32>
    %c0_1 = arith.constant 0 : index
    %c0_2 = arith.constant 0 : index
    %1 = vector.load %arg2[%c0_1, %c0_2] : memref<80x16xf32, #tpu.memory_space<vmem>>, vector<80x16xf32>
    %c0_3 = arith.constant 0 : index
    %c0_4 = arith.constant 0 : index
    %2 = vector.load %arg3[%c0_3, %c0_4] : memref<32x32xf32, #tpu.memory_space<vmem>>, vector<32x32xf32>
    %c0_5 = arith.constant 0 : index
    %c0_6 = arith.constant 0 : index
    %3 = vector.load %arg4[%c0_5, %c0_6] : memref<32x32xf32, #tpu.memory_space<vmem>>, vector<32x32xf32>
    %cst = arith.constant dense<0.000000e+00> : vector<128x32xf32>
    %4 = tpu.matmul %0, %2, %cst {dimension_numbers = #tpu.dot_dimension_numbers<[1], [0], [0], [1], [0, 0, 1, 1], [], []>} : vector<128x32xf32>, vector<32x32xf32>, vector<128x32xf32> -> vector<128x32xf32>
    %cst_7 = arith.constant dense<0.000000e+00> : vector<128x32xf32>
    %5 = tpu.matmul %0, %3, %cst_7 {dimension_numbers = #tpu.dot_dimension_numbers<[1], [0], [0], [1], [0, 0, 1, 1], [], []>} : vector<128x32xf32>, vector<32x32xf32>, vector<128x32xf32> -> vector<128x32xf32>
    %c0_8 = arith.constant 0 : index
    %c0_9 = arith.constant 0 : index
    %6 = vector.load %arg6[%c0_8, %c0_9] : memref<128x32xf32, #tpu.memory_space<vmem>>, vector<128x32xf32>
    %7 = arith.mulf %4, %6 : vector<128x32xf32>
    %c0_10 = arith.constant 0 : index
    %c0_11 = arith.constant 0 : index
    %c0_12 = arith.constant 0 : index
    %8 = vector.load %arg5[%c0_10, %c0_11, %c0_12] : memref<5x16x32xf32, #tpu.memory_space<vmem>>, vector<5x16x32xf32>
    %9 = vector.extract_strided_slice %5 {offsets = [0, 0], sizes = [16, 32], strides = [1, 1]} : vector<128x32xf32> to vector<16x32xf32>
    %cst_13 = arith.constant dense<0.000000e+00> : vector<80x32xf32>
    %10 = tpu.matmul %1, %9, %cst_13 {dimension_numbers = #tpu.dot_dimension_numbers<[1], [0], [0], [1], [0, 0, 1, 1], [], []>} : vector<80x16xf32>, vector<16x32xf32>, vector<80x32xf32> -> vector<80x32xf32>
    %11 = vector.shape_cast %10 : vector<80x32xf32> to vector<5x16x32xf32>
    %12 = arith.mulf %8, %11 : vector<5x16x32xf32>
    %cst_14 = arith.constant dense<0.000000e+00> : vector<16x32xf32>
    %13 = vector.multi_reduction <add>, %12, %cst_14 [0] : vector<5x16x32xf32> to vector<16x32xf32>
    %14 = vector.extract_strided_slice %5 {offsets = [16, 0], sizes = [16, 32], strides = [1, 1]} : vector<128x32xf32> to vector<16x32xf32>
    %cst_15 = arith.constant dense<0.000000e+00> : vector<80x32xf32>
    %15 = tpu.matmul %1, %14, %cst_15 {dimension_numbers = #tpu.dot_dimension_numbers<[1], [0], [0], [1], [0, 0, 1, 1], [], []>} : vector<80x16xf32>, vector<16x32xf32>, vector<80x32xf32> -> vector<80x32xf32>
    %16 = vector.shape_cast %15 : vector<80x32xf32> to vector<5x16x32xf32>
    %17 = arith.mulf %8, %16 : vector<5x16x32xf32>
    %cst_16 = arith.constant dense<0.000000e+00> : vector<16x32xf32>
    %18 = vector.multi_reduction <add>, %17, %cst_16 [0] : vector<5x16x32xf32> to vector<16x32xf32>
    %19 = vector.extract_strided_slice %5 {offsets = [32, 0], sizes = [16, 32], strides = [1, 1]} : vector<128x32xf32> to vector<16x32xf32>
    %cst_17 = arith.constant dense<0.000000e+00> : vector<80x32xf32>
    %20 = tpu.matmul %1, %19, %cst_17 {dimension_numbers = #tpu.dot_dimension_numbers<[1], [0], [0], [1], [0, 0, 1, 1], [], []>} : vector<80x16xf32>, vector<16x32xf32>, vector<80x32xf32> -> vector<80x32xf32>
    %21 = vector.shape_cast %20 : vector<80x32xf32> to vector<5x16x32xf32>
    %22 = arith.mulf %8, %21 : vector<5x16x32xf32>
    %cst_18 = arith.constant dense<0.000000e+00> : vector<16x32xf32>
    %23 = vector.multi_reduction <add>, %22, %cst_18 [0] : vector<5x16x32xf32> to vector<16x32xf32>
    %24 = vector.extract_strided_slice %5 {offsets = [48, 0], sizes = [16, 32], strides = [1, 1]} : vector<128x32xf32> to vector<16x32xf32>
    %cst_19 = arith.constant dense<0.000000e+00> : vector<80x32xf32>
    %25 = tpu.matmul %1, %24, %cst_19 {dimension_numbers = #tpu.dot_dimension_numbers<[1], [0], [0], [1], [0, 0, 1, 1], [], []>} : vector<80x16xf32>, vector<16x32xf32>, vector<80x32xf32> -> vector<80x32xf32>
    %26 = vector.shape_cast %25 : vector<80x32xf32> to vector<5x16x32xf32>
    %27 = arith.mulf %8, %26 : vector<5x16x32xf32>
    %cst_20 = arith.constant dense<0.000000e+00> : vector<16x32xf32>
    %28 = vector.multi_reduction <add>, %27, %cst_20 [0] : vector<5x16x32xf32> to vector<16x32xf32>
    %29 = vector.extract_strided_slice %5 {offsets = [64, 0], sizes = [16, 32], strides = [1, 1]} : vector<128x32xf32> to vector<16x32xf32>
    %cst_21 = arith.constant dense<0.000000e+00> : vector<80x32xf32>
    %30 = tpu.matmul %1, %29, %cst_21 {dimension_numbers = #tpu.dot_dimension_numbers<[1], [0], [0], [1], [0, 0, 1, 1], [], []>} : vector<80x16xf32>, vector<16x32xf32>, vector<80x32xf32> -> vector<80x32xf32>
    %31 = vector.shape_cast %30 : vector<80x32xf32> to vector<5x16x32xf32>
    %32 = arith.mulf %8, %31 : vector<5x16x32xf32>
    %cst_22 = arith.constant dense<0.000000e+00> : vector<16x32xf32>
    %33 = vector.multi_reduction <add>, %32, %cst_22 [0] : vector<5x16x32xf32> to vector<16x32xf32>
    %34 = vector.extract_strided_slice %5 {offsets = [80, 0], sizes = [16, 32], strides = [1, 1]} : vector<128x32xf32> to vector<16x32xf32>
    %cst_23 = arith.constant dense<0.000000e+00> : vector<80x32xf32>
    %35 = tpu.matmul %1, %34, %cst_23 {dimension_numbers = #tpu.dot_dimension_numbers<[1], [0], [0], [1], [0, 0, 1, 1], [], []>} : vector<80x16xf32>, vector<16x32xf32>, vector<80x32xf32> -> vector<80x32xf32>
    %36 = vector.shape_cast %35 : vector<80x32xf32> to vector<5x16x32xf32>
    %37 = arith.mulf %8, %36 : vector<5x16x32xf32>
    %cst_24 = arith.constant dense<0.000000e+00> : vector<16x32xf32>
    %38 = vector.multi_reduction <add>, %37, %cst_24 [0] : vector<5x16x32xf32> to vector<16x32xf32>
    %39 = vector.extract_strided_slice %5 {offsets = [96, 0], sizes = [16, 32], strides = [1, 1]} : vector<128x32xf32> to vector<16x32xf32>
    %cst_25 = arith.constant dense<0.000000e+00> : vector<80x32xf32>
    %40 = tpu.matmul %1, %39, %cst_25 {dimension_numbers = #tpu.dot_dimension_numbers<[1], [0], [0], [1], [0, 0, 1, 1], [], []>} : vector<80x16xf32>, vector<16x32xf32>, vector<80x32xf32> -> vector<80x32xf32>
    %41 = vector.shape_cast %40 : vector<80x32xf32> to vector<5x16x32xf32>
    %42 = arith.mulf %8, %41 : vector<5x16x32xf32>
    %cst_26 = arith.constant dense<0.000000e+00> : vector<16x32xf32>
    %43 = vector.multi_reduction <add>, %42, %cst_26 [0] : vector<5x16x32xf32> to vector<16x32xf32>
    %44 = vector.extract_strided_slice %5 {offsets = [112, 0], sizes = [16, 32], strides = [1, 1]} : vector<128x32xf32> to vector<16x32xf32>
    %cst_27 = arith.constant dense<0.000000e+00> : vector<80x32xf32>
    %45 = tpu.matmul %1, %44, %cst_27 {dimension_numbers = #tpu.dot_dimension_numbers<[1], [0], [0], [1], [0, 0, 1, 1], [], []>} : vector<80x16xf32>, vector<16x32xf32>, vector<80x32xf32> -> vector<80x32xf32>
    %46 = vector.shape_cast %45 : vector<80x32xf32> to vector<5x16x32xf32>
    %47 = arith.mulf %8, %46 : vector<5x16x32xf32>
    %cst_28 = arith.constant dense<0.000000e+00> : vector<16x32xf32>
    %48 = vector.multi_reduction <add>, %47, %cst_28 [0] : vector<5x16x32xf32> to vector<16x32xf32>
    %49 = tpu.concatenate %13, %18, %23, %28, %33, %38, %43, %48 in 0 : vector<16x32xf32>, vector<16x32xf32>, vector<16x32xf32>, vector<16x32xf32>, vector<16x32xf32>, vector<16x32xf32>, vector<16x32xf32>, vector<16x32xf32> -> vector<128x32xf32>
    %50 = arith.addf %7, %49 : vector<128x32xf32>
    %c0_29 = arith.constant 0 : index
    %c0_30 = arith.constant 0 : index
    %51 = vector.load %arg7[%c0_29, %c0_30] : memref<1x32xf32, #tpu.memory_space<vmem>>, vector<1x32xf32>
    %52 = vector.broadcast %51 : vector<1x32xf32> to vector<128x32xf32>
    %53 = arith.mulf %50, %52 : vector<128x32xf32>
    %c0_31 = arith.constant 0 : index
    %c0_32 = arith.constant 0 : index
    %54 = vector.load %arg8[%c0_31, %c0_32] : memref<1x32xf32, #tpu.memory_space<vmem>>, vector<1x32xf32>
    %55 = vector.broadcast %54 : vector<1x32xf32> to vector<128x32xf32>
    %56 = arith.addf %53, %55 : vector<128x32xf32>
    %cst_33 = arith.constant 0.000000e+00 : f32
    %57 = vector.broadcast %cst_33 : f32 to vector<128x32xf32>
    %58 = arith.maximumf %56, %57 : vector<128x32xf32>
    %c0_34 = arith.constant 0 : index
    %c0_35 = arith.constant 0 : index
    %59 = vector.load %arg9[%c0_34, %c0_35] : memref<32x32xf32, #tpu.memory_space<vmem>>, vector<32x32xf32>
    %c0_36 = arith.constant 0 : index
    %c0_37 = arith.constant 0 : index
    %60 = vector.load %arg10[%c0_36, %c0_37] : memref<32x32xf32, #tpu.memory_space<vmem>>, vector<32x32xf32>
    %cst_38 = arith.constant dense<0.000000e+00> : vector<128x32xf32>
    %61 = tpu.matmul %58, %59, %cst_38 {dimension_numbers = #tpu.dot_dimension_numbers<[1], [0], [0], [1], [0, 0, 1, 1], [], []>} : vector<128x32xf32>, vector<32x32xf32>, vector<128x32xf32> -> vector<128x32xf32>
    %cst_39 = arith.constant dense<0.000000e+00> : vector<128x32xf32>
    %62 = tpu.matmul %58, %60, %cst_39 {dimension_numbers = #tpu.dot_dimension_numbers<[1], [0], [0], [1], [0, 0, 1, 1], [], []>} : vector<128x32xf32>, vector<32x32xf32>, vector<128x32xf32> -> vector<128x32xf32>
    %c0_40 = arith.constant 0 : index
    %c0_41 = arith.constant 0 : index
    %63 = vector.load %arg12[%c0_40, %c0_41] : memref<128x32xf32, #tpu.memory_space<vmem>>, vector<128x32xf32>
    %64 = arith.mulf %61, %63 : vector<128x32xf32>
    %c0_42 = arith.constant 0 : index
    %c0_43 = arith.constant 0 : index
    %c0_44 = arith.constant 0 : index
    %65 = vector.load %arg11[%c0_42, %c0_43, %c0_44] : memref<5x16x32xf32, #tpu.memory_space<vmem>>, vector<5x16x32xf32>
    %66 = vector.extract_strided_slice %62 {offsets = [0, 0], sizes = [16, 32], strides = [1, 1]} : vector<128x32xf32> to vector<16x32xf32>
    %cst_45 = arith.constant dense<0.000000e+00> : vector<80x32xf32>
    %67 = tpu.matmul %1, %66, %cst_45 {dimension_numbers = #tpu.dot_dimension_numbers<[1], [0], [0], [1], [0, 0, 1, 1], [], []>} : vector<80x16xf32>, vector<16x32xf32>, vector<80x32xf32> -> vector<80x32xf32>
    %68 = vector.shape_cast %67 : vector<80x32xf32> to vector<5x16x32xf32>
    %69 = arith.mulf %65, %68 : vector<5x16x32xf32>
    %cst_46 = arith.constant dense<0.000000e+00> : vector<16x32xf32>
    %70 = vector.multi_reduction <add>, %69, %cst_46 [0] : vector<5x16x32xf32> to vector<16x32xf32>
    %71 = vector.extract_strided_slice %62 {offsets = [16, 0], sizes = [16, 32], strides = [1, 1]} : vector<128x32xf32> to vector<16x32xf32>
    %cst_47 = arith.constant dense<0.000000e+00> : vector<80x32xf32>
    %72 = tpu.matmul %1, %71, %cst_47 {dimension_numbers = #tpu.dot_dimension_numbers<[1], [0], [0], [1], [0, 0, 1, 1], [], []>} : vector<80x16xf32>, vector<16x32xf32>, vector<80x32xf32> -> vector<80x32xf32>
    %73 = vector.shape_cast %72 : vector<80x32xf32> to vector<5x16x32xf32>
    %74 = arith.mulf %65, %73 : vector<5x16x32xf32>
    %cst_48 = arith.constant dense<0.000000e+00> : vector<16x32xf32>
    %75 = vector.multi_reduction <add>, %74, %cst_48 [0] : vector<5x16x32xf32> to vector<16x32xf32>
    %76 = vector.extract_strided_slice %62 {offsets = [32, 0], sizes = [16, 32], strides = [1, 1]} : vector<128x32xf32> to vector<16x32xf32>
    %cst_49 = arith.constant dense<0.000000e+00> : vector<80x32xf32>
    %77 = tpu.matmul %1, %76, %cst_49 {dimension_numbers = #tpu.dot_dimension_numbers<[1], [0], [0], [1], [0, 0, 1, 1], [], []>} : vector<80x16xf32>, vector<16x32xf32>, vector<80x32xf32> -> vector<80x32xf32>
    %78 = vector.shape_cast %77 : vector<80x32xf32> to vector<5x16x32xf32>
    %79 = arith.mulf %65, %78 : vector<5x16x32xf32>
    %cst_50 = arith.constant dense<0.000000e+00> : vector<16x32xf32>
    %80 = vector.multi_reduction <add>, %79, %cst_50 [0] : vector<5x16x32xf32> to vector<16x32xf32>
    %81 = vector.extract_strided_slice %62 {offsets = [48, 0], sizes = [16, 32], strides = [1, 1]} : vector<128x32xf32> to vector<16x32xf32>
    %cst_51 = arith.constant dense<0.000000e+00> : vector<80x32xf32>
    %82 = tpu.matmul %1, %81, %cst_51 {dimension_numbers = #tpu.dot_dimension_numbers<[1], [0], [0], [1], [0, 0, 1, 1], [], []>} : vector<80x16xf32>, vector<16x32xf32>, vector<80x32xf32> -> vector<80x32xf32>
    %83 = vector.shape_cast %82 : vector<80x32xf32> to vector<5x16x32xf32>
    %84 = arith.mulf %65, %83 : vector<5x16x32xf32>
    %cst_52 = arith.constant dense<0.000000e+00> : vector<16x32xf32>
    %85 = vector.multi_reduction <add>, %84, %cst_52 [0] : vector<5x16x32xf32> to vector<16x32xf32>
    %86 = vector.extract_strided_slice %62 {offsets = [64, 0], sizes = [16, 32], strides = [1, 1]} : vector<128x32xf32> to vector<16x32xf32>
    %cst_53 = arith.constant dense<0.000000e+00> : vector<80x32xf32>
    %87 = tpu.matmul %1, %86, %cst_53 {dimension_numbers = #tpu.dot_dimension_numbers<[1], [0], [0], [1], [0, 0, 1, 1], [], []>} : vector<80x16xf32>, vector<16x32xf32>, vector<80x32xf32> -> vector<80x32xf32>
    %88 = vector.shape_cast %87 : vector<80x32xf32> to vector<5x16x32xf32>
    %89 = arith.mulf %65, %88 : vector<5x16x32xf32>
    %cst_54 = arith.constant dense<0.000000e+00> : vector<16x32xf32>
    %90 = vector.multi_reduction <add>, %89, %cst_54 [0] : vector<5x16x32xf32> to vector<16x32xf32>
    %91 = vector.extract_strided_slice %62 {offsets = [80, 0], sizes = [16, 32], strides = [1, 1]} : vector<128x32xf32> to vector<16x32xf32>
    %cst_55 = arith.constant dense<0.000000e+00> : vector<80x32xf32>
    %92 = tpu.matmul %1, %91, %cst_55 {dimension_numbers = #tpu.dot_dimension_numbers<[1], [0], [0], [1], [0, 0, 1, 1], [], []>} : vector<80x16xf32>, vector<16x32xf32>, vector<80x32xf32> -> vector<80x32xf32>
    %93 = vector.shape_cast %92 : vector<80x32xf32> to vector<5x16x32xf32>
    %94 = arith.mulf %65, %93 : vector<5x16x32xf32>
    %cst_56 = arith.constant dense<0.000000e+00> : vector<16x32xf32>
    %95 = vector.multi_reduction <add>, %94, %cst_56 [0] : vector<5x16x32xf32> to vector<16x32xf32>
    %96 = vector.extract_strided_slice %62 {offsets = [96, 0], sizes = [16, 32], strides = [1, 1]} : vector<128x32xf32> to vector<16x32xf32>
    %cst_57 = arith.constant dense<0.000000e+00> : vector<80x32xf32>
    %97 = tpu.matmul %1, %96, %cst_57 {dimension_numbers = #tpu.dot_dimension_numbers<[1], [0], [0], [1], [0, 0, 1, 1], [], []>} : vector<80x16xf32>, vector<16x32xf32>, vector<80x32xf32> -> vector<80x32xf32>
    %98 = vector.shape_cast %97 : vector<80x32xf32> to vector<5x16x32xf32>
    %99 = arith.mulf %65, %98 : vector<5x16x32xf32>
    %cst_58 = arith.constant dense<0.000000e+00> : vector<16x32xf32>
    %100 = vector.multi_reduction <add>, %99, %cst_58 [0] : vector<5x16x32xf32> to vector<16x32xf32>
    %101 = vector.extract_strided_slice %62 {offsets = [112, 0], sizes = [16, 32], strides = [1, 1]} : vector<128x32xf32> to vector<16x32xf32>
    %cst_59 = arith.constant dense<0.000000e+00> : vector<80x32xf32>
    %102 = tpu.matmul %1, %101, %cst_59 {dimension_numbers = #tpu.dot_dimension_numbers<[1], [0], [0], [1], [0, 0, 1, 1], [], []>} : vector<80x16xf32>, vector<16x32xf32>, vector<80x32xf32> -> vector<80x32xf32>
    %103 = vector.shape_cast %102 : vector<80x32xf32> to vector<5x16x32xf32>
    %104 = arith.mulf %65, %103 : vector<5x16x32xf32>
    %cst_60 = arith.constant dense<0.000000e+00> : vector<16x32xf32>
    %105 = vector.multi_reduction <add>, %104, %cst_60 [0] : vector<5x16x32xf32> to vector<16x32xf32>
    %106 = tpu.concatenate %70, %75, %80, %85, %90, %95, %100, %105 in 0 : vector<16x32xf32>, vector<16x32xf32>, vector<16x32xf32>, vector<16x32xf32>, vector<16x32xf32>, vector<16x32xf32>, vector<16x32xf32>, vector<16x32xf32> -> vector<128x32xf32>
    %107 = arith.addf %64, %106 : vector<128x32xf32>
    %c0_61 = arith.constant 0 : index
    %c0_62 = arith.constant 0 : index
    %108 = vector.load %arg13[%c0_61, %c0_62] : memref<1x32xf32, #tpu.memory_space<vmem>>, vector<1x32xf32>
    %109 = vector.broadcast %108 : vector<1x32xf32> to vector<128x32xf32>
    %110 = arith.mulf %107, %109 : vector<128x32xf32>
    %c0_63 = arith.constant 0 : index
    %c0_64 = arith.constant 0 : index
    %111 = vector.load %arg14[%c0_63, %c0_64] : memref<1x32xf32, #tpu.memory_space<vmem>>, vector<1x32xf32>
    %112 = vector.broadcast %111 : vector<1x32xf32> to vector<128x32xf32>
    %113 = arith.addf %110, %112 : vector<128x32xf32>
    %cst_65 = arith.constant 0.000000e+00 : f32
    %114 = vector.broadcast %cst_65 : f32 to vector<128x32xf32>
    %115 = arith.maximumf %113, %114 : vector<128x32xf32>
    %116 = arith.addf %0, %115 : vector<128x32xf32>
    %c0_66 = arith.constant 0 : index
    %c0_67 = arith.constant 0 : index
    %117 = vector.load %arg15[%c0_66, %c0_67] : memref<128x32xf32, #tpu.memory_space<vmem>>, vector<128x32xf32>
    tpu.vector_store %arg15[%c0_66, %c0_67], %116 {strides = array<i32>} : memref<128x32xf32, #tpu.memory_space<vmem>>, vector<128x32xf32>,
    return
  }
  func.func @transform_0(%arg0: i32) -> (i32, i32) {
    %c0_i32 = arith.constant 0 : i32
    %c0_i32_0 = arith.constant 0 : i32
    return %arg0, %c0_i32 : i32, i32
  }
  func.func @transform_1(%arg0: i32) -> (i32, i32) {
    %c0_i32 = arith.constant 0 : i32
    %c0_i32_0 = arith.constant 0 : i32
    %c0_i32_1 = arith.constant 0 : i32
    return %c0_i32, %c0_i32_0 : i32, i32
  }
  func.func @transform_2(%arg0: i32) -> (i32, i32) {
    %c0_i32 = arith.constant 0 : i32
    %c0_i32_0 = arith.constant 0 : i32
    %c0_i32_1 = arith.constant 0 : i32
    return %c0_i32, %c0_i32_0 : i32, i32
  }
  func.func @transform_3(%arg0: i32) -> (i32, i32) {
    %c0_i32 = arith.constant 0 : i32
    %c0_i32_0 = arith.constant 0 : i32
    %c0_i32_1 = arith.constant 0 : i32
    return %c0_i32, %c0_i32_0 : i32, i32
  }
  func.func @transform_4(%arg0: i32) -> (i32, i32, i32) {
    %c0_i32 = arith.constant 0 : i32
    %c0_i32_0 = arith.constant 0 : i32
    %c0_i32_1 = arith.constant 0 : i32
    %c0_i32_2 = arith.constant 0 : i32
    return %c0_i32, %c0_i32_0, %c0_i32_1 : i32, i32, i32
  }
  func.func @transform_5(%arg0: i32) -> (i32, i32) {
    %c0_i32 = arith.constant 0 : i32
    %c0_i32_0 = arith.constant 0 : i32
    %c0_i32_1 = arith.constant 0 : i32
    return %c0_i32, %c0_i32_0 : i32, i32
  }
  func.func @transform_6(%arg0: i32) -> (i32, i32) {
    %c0_i32 = arith.constant 0 : i32
    %c0_i32_0 = arith.constant 0 : i32
    %c0_i32_1 = arith.constant 0 : i32
    return %c0_i32, %c0_i32_0 : i32, i32
  }
  func.func @transform_7(%arg0: i32) -> (i32, i32) {
    %c0_i32 = arith.constant 0 : i32
    %c0_i32_0 = arith.constant 0 : i32
    %c0_i32_1 = arith.constant 0 : i32
    return %c0_i32, %c0_i32_0 : i32, i32
  }
  func.func @transform_8(%arg0: i32) -> (i32, i32) {
    %c0_i32 = arith.constant 0 : i32
    %c0_i32_0 = arith.constant 0 : i32
    %c0_i32_1 = arith.constant 0 : i32
    return %c0_i32, %c0_i32_0 : i32, i32
  }
  func.func @transform_9(%arg0: i32) -> (i32, i32) {
    %c0_i32 = arith.constant 0 : i32
    %c0_i32_0 = arith.constant 0 : i32
    %c0_i32_1 = arith.constant 0 : i32
    return %c0_i32, %c0_i32_0 : i32, i32
  }
  func.func @transform_10(%arg0: i32) -> (i32, i32, i32) {
    %c0_i32 = arith.constant 0 : i32
    %c0_i32_0 = arith.constant 0 : i32
    %c0_i32_1 = arith.constant 0 : i32
    %c0_i32_2 = arith.constant 0 : i32
    return %c0_i32, %c0_i32_0, %c0_i32_1 : i32, i32, i32
  }
  func.func @transform_11(%arg0: i32) -> (i32, i32) {
    %c0_i32 = arith.constant 0 : i32
    %c0_i32_0 = arith.constant 0 : i32
    %c0_i32_1 = arith.constant 0 : i32
    return %c0_i32, %c0_i32_0 : i32, i32
  }
  func.func @transform_12(%arg0: i32) -> (i32, i32) {
    %c0_i32 = arith.constant 0 : i32
    %c0_i32_0 = arith.constant 0 : i32
    %c0_i32_1 = arith.constant 0 : i32
    return %c0_i32, %c0_i32_0 : i32, i32
  }
  func.func @transform_13(%arg0: i32) -> (i32, i32) {
    %c0_i32 = arith.constant 0 : i32
    %c0_i32_0 = arith.constant 0 : i32
    %c0_i32_1 = arith.constant 0 : i32
    return %c0_i32, %c0_i32_0 : i32, i32
  }
  func.func @transform_14(%arg0: i32) -> (i32, i32) {
    %c0_i32 = arith.constant 0 : i32
    %c0_i32_0 = arith.constant 0 : i32
    return %arg0, %c0_i32 : i32, i32
  }
}

</mosaic_0001>

<bundles_post_ra>
// kernel: tpu_custom_call.1
= control target key start
LH: loop header
LB: loop body
LE: loop exit
PB: predicated region body
PF: predicated region fallthrough
CT: control target
= control target key end

     0   :  { %s4993_s29 = smov 0   ;;  %s6313_s0 = inlined_call_operand.vmem [shape: f32[256,32], index: 0, kind: input, shape index: {}]   ;;  %s6314_s1 = inlined_call_operand.vmem [shape: f32[80,16], index: 1, kind: input, shape index: {}]   ;;  %s6315_s2 = inlined_call_operand.vmem [shape: f32[32,32], index: 2, kind: input, shape index: {}]   ;;  %s6316_s3 = inlined_call_operand.vmem [shape: f32[32,32], index: 3, kind: input, shape index: {}]   ;;  %s6317_s4 = inlined_call_operand.vmem [shape: f32[5,16,32], index: 4, kind: input, shape index: {}]   ;;  %s6318_s5 = inlined_call_operand.vmem [shape: f32[128,32], index: 5, kind: input, shape index: {}]   ;;  %s6319_s6 = inlined_call_operand.vmem [shape: f32[1,32], index: 6, kind: input, shape index: {}]   ;;  %s6320_s7 = inlined_call_operand.vmem [shape: f32[1,32], index: 7, kind: input, shape index: {}]   ;;  %s6321_s8 = inlined_call_operand.vmem [shape: f32[32,32], index: 8, kind: input, shape index: {}]   ;;  %s6322_s9 = inlined_call_operand.vmem [shape: f32[32,32], index: 9, kind: input, shape index: {}]   ;;  %s6323_s10 = inlined_call_operand.vmem [shape: f32[5,16,32], index: 10, kind: input, shape index: {}]   ;;  %s6324_s11 = inlined_call_operand.vmem [shape: f32[128,32], index: 11, kind: input, shape index: {}]   ;;  %s6325_s12 = inlined_call_operand.vmem [shape: f32[1,32], index: 12, kind: input, shape index: {}]   ;;  %s6326_s13 = inlined_call_operand.vmem [shape: f32[1,32], index: 13, kind: input, shape index: {}]   ;;  %s6327_s14 = inlined_call_operand.vmem [shape: f32[256,32], index: 14, kind: output, shape index: {}]  }
   0x1 LB: > { %s3837_s30 = sadd.s32 4294967295, %s4916_s29   ;;  %p3841_p0 = scmp.ge.s32.totalorder %s4916_s29, 1  ;;  %s4916_s29 = sphi %s4993_s29, %s24_s29  }
   0x2   : > { %p413_p1 = scmp.lt.s32.totalorder %s4916_s29, 3 }
   0x4   : > { %p414_p2 = pnand %p3841_p0, %p413_p1 }
   0x5   : > { %v501_v0 = vld [vmem:[%s6316_s3] sm:$0xff] (!%p414_p2)  ;;  %v502_v1 = vld [vmem:[%s6316_s3 + $0x8] sm:$0xff] (!%p414_p2)  ;;  %v503_v2 = vld [vmem:[%s6316_s3 + $0x10] sm:$0xff] (!%p414_p2)  ;;  %s3842_s21 = sshll.u32 (!%p414_p2), %s3837_s30, 4  ;;  %vm505_vm0 = vcmask (!%p414_p2), 261120   ;;  %vm886_vm1 = vcmask (!%p414_p2), 130048  }
   0x6   : > { %417 = sbr.rel (%p414_p2) target bundleno = 1009 (0x3f1), region = 76  ;;  %v4788_v3 = vpack.c.bf16 (!%p414_p2), %v502_v1, %v501_v0  ;;  %v504_v4 = vld [vmem:[%s6316_s3 + $0x18] sm:$0xff] (!%p414_p2)  ;;  %p460_p3 = scmp.lt.s32.totalorder (!%p414_p2), %s3842_s21, 31  ;;  %v497_v5 = vld [vmem:[%s6315_s2] sm:$0xff] (!%p414_p2)  ;;  %v498_v6 = vld [vmem:[%s6315_s2 + $0x8] sm:$0xff] (!%p414_p2) }
   0x7   : > { %v4792_v7 = vpack.c.bf16 (!%p414_p2), %v504_v4, %v503_v2  ;;  %v4780_v8 = vpack.c.bf16 (!%p414_p2), %v498_v6, %v497_v5  ;;  %v499_v9 = vld [vmem:[%s6315_s2 + $0x10] sm:$0xff] (!%p414_p2)  ;;  %v500_v10 = vld [vmem:[%s6315_s2 + $0x18] sm:$0xff] (!%p414_p2)  ;;  %v5086_v28 = vld [vmem:[%s6314_s1] sm:$0xff] (!%p414_p2) }
   0x8   : > { %4789 = vmatprep.subr.bf16.mxu1 (!%p414_p2), %v4788_v3  ;;  %v4784_v11 = vpack.c.bf16 (!%p414_p2), %v500_v10, %v499_v9  ;;  %v5099_v36 = vld [vmem:[%s6314_s1 + $0x8] sm:$0xff] (!%p414_p2)  ;;  %v5106_v39 = vld [vmem:[%s6314_s1 + $0x10] sm:$0xff] (!%p414_p2)  ;;  %v5117_v42 = vld [vmem:[%s6314_s1 + $0x18] sm:$0xff] (!%p414_p2) }
   0x9   : > { %4791 = vmatpush3.bf16.msra.mxu1 (!%p414_p2), %v4788_v3  ;;  %4781 = vmatprep.subr.bf16.mxu0 (!%p414_p2), %v4780_v8  ;;  %v5124_v45 = vld [vmem:[%s6314_s1 + $0x20] sm:$0xff] (!%p414_p2)  ;;  %v5139_v49 = vld [vmem:[%s6314_s1 + $0x28] sm:$0xff] (!%p414_p2)  ;;  %v5146_v52 = vld [vmem:[%s6314_s1 + $0x30] sm:$0xff] (!%p414_p2) }
   0xa   : > { %4793 = vmatprep.subr.bf16.mxu1 (!%p414_p2), %v4792_v7  ;;  %4783 = vmatpush3.bf16.msra.mxu0 (!%p414_p2), %v4780_v8  ;;  %v5161_v56 = vld [vmem:[%s6314_s1 + $0x38] sm:$0xff] (!%p414_p2)  ;;  %v5168_v59 = vld [vmem:[%s6314_s1 + $0x40] sm:$0xff] (!%p414_p2)  ;;  %v5183_v63 = vld [vmem:[%s6314_s1 + $0x48] sm:$0xff] (!%p414_p2) }
   0xb   : > { %4785 = vmatprep.subr.bf16.mxu0 (!%p414_p2), %v4784_v11 }
   0xd   : > { %s6329_s21 = smov (!%p460_p3, %s3842_s21), 31  ;;  %4795 = vmatpush3.bf16.msra.mxu1 %v4792_v7 }
   0xe   : > { %s3843_s17 = sshll.u32 %s6329_s21, 3  ;;  %4787 = vmatpush3.bf16.msra.mxu0 %v4784_v11 }
   0xf   : > { %s5033_s20 = scalar_lea.vmem %s6313_s0, %s3843_s17  ;;  %s6074_s24 = scalar_lea.vmem %s6327_s14, %s3843_s17 }
  0x10   : > { %v471_v12 = vld [vmem:[%s5033_s20] sm:$0xff]  ;;  %v472_v13 = vld [vmem:[%s5033_s20 + $0x8] sm:$0xff]  ;;  %v473_v14 = vld [vmem:[%s5033_s20 + $0x10] sm:$0xff] }
  0x11   : > { %4388 = vmatprep.mubr.msk.f32.mxu1 %vm505_vm0, %v471_v12  ;;  %4356 = vmatprep.mubr.msk.f32.mxu0 %vm505_vm0, %v471_v12  ;;  %v474_v15 = vld [vmem:[%s5033_s20 + $0x18] sm:$0xff]  ;;  %v475_v16 = vld [vmem:[%s5033_s20 + $0x20] sm:$0xff]  ;;  %v476_v17 = vld [vmem:[%s5033_s20 + $0x28] sm:$0xff] }
  0x12   : > { %4389 = vmatmul.mubr.msk.f32.vlgmr.msra.gmra.mrb[0].mxu1 %vm505_vm0, %v472_v13  ;;  %4357 = vmatmul.mubr.msk.f32.vlgmr.msra.gmra.mrb[0].mxu0 %vm505_vm0, %v472_v13  ;;  %v477_v18 = vld [vmem:[%s5033_s20 + $0x30] sm:$0xff]  ;;  %v478_v19 = vld [vmem:[%s5033_s20 + $0x38] sm:$0xff]  ;;  %v479_v20 = vld [vmem:[%s5033_s20 + $0x40] sm:$0xff] }
  0x13   : > { %4391 = vmatprep.mubr.msk.f32.mxu1 %vm505_vm0, %v473_v14  ;;  %4359 = vmatprep.mubr.msk.f32.mxu0 %vm505_vm0, %v473_v14  ;;  %v480_v21 = vld [vmem:[%s5033_s20 + $0x48] sm:$0xff]  ;;  %v481_v22 = vld [vmem:[%s5033_s20 + $0x50] sm:$0xff]  ;;  %v482_v23 = vld [vmem:[%s5033_s20 + $0x58] sm:$0xff] }
  0x14   : > { %v483_v24 = vld [vmem:[%s5033_s20 + $0x60] sm:$0xff]  ;;  %v484_v25 = vld [vmem:[%s5033_s20 + $0x68] sm:$0xff]  ;;  %v485_v26 = vld [vmem:[%s5033_s20 + $0x70] sm:$0xff] }
  0x15   : > { %v486_v27 = vld [vmem:[%s5033_s20 + $0x78] sm:$0xff]  ;;  %v2139_v14 = vld [vmem:[%s6321_s8] sm:$0xff] }
  0x16   : > { %4392 = vmatmul.mubr.msk.f32.gmra.mrb[2].mxu1 %vm505_vm0, %v474_v15  ;;  %4360 = vmatmul.mubr.msk.f32.gmra.mrb[2].mxu0 %vm505_vm0, %v474_v15  ;;  %v2140_v15 = vld [vmem:[%s6321_s8 + $0x8] sm:$0xff] }
  0x17   : > { %4394 = vmatprep.mubr.msk.f32.mxu1 %vm505_vm0, %v475_v16  ;;  %4362 = vmatprep.mubr.msk.f32.mxu0 %vm505_vm0, %v475_v16  ;;  %v2143_v16 = vld [vmem:[%s6322_s9] sm:$0xff] }
  0x1a   : > { %4395 = vmatmul.mubr.msk.f32.gmra.mrb[4].mxu1 %vm505_vm0, %v476_v17  ;;  %4363 = vmatmul.mubr.msk.f32.gmra.mrb[4].mxu0 %vm505_vm0, %v476_v17  ;;  %v4828_v17 = vpack.c.bf16 %v2140_v15, %v2139_v14  ;;  %v5405_v15 = vld [vmem:[%s6317_s4 + $0x30] sm:$0xff] }
  0x1b   : > { %4397 = vmatprep.mubr.msk.f32.mxu1 %vm505_vm0, %v477_v18  ;;  %4365 = vmatprep.mubr.msk.f32.mxu0 %vm505_vm0, %v477_v18  ;;  %v2144_v18 = vld [vmem:[%s6322_s9 + $0x8] sm:$0xff] }
  0x1e   : > { %4398 = vmatmul.mubr.msk.f32.gmra.mrb[6].mxu1 %vm505_vm0, %v478_v19  ;;  %4366 = vmatmul.mubr.msk.f32.gmra.mrb[6].mxu0 %vm505_vm0, %v478_v19  ;;  %v4836_v19 = vpack.c.bf16 %v2144_v18, %v2143_v16 }
  0x1f   : > { %4400 = vmatprep.mubr.msk.f32.mxu1 %vm505_vm0, %v479_v20  ;;  %4368 = vmatprep.mubr.msk.f32.mxu0 %vm505_vm0, %v479_v20  ;;  %v2141_v20 = vld [vmem:[%s6321_s8 + $0x10] sm:$0xff] }
  0x22   : > { %4401 = vmatmul.mubr.msk.f32.gmra.mrb[8].mxu1 %vm505_vm0, %v480_v21  ;;  %4369 = vmatmul.mubr.msk.f32.gmra.mrb[8].mxu0 %vm505_vm0, %v480_v21  ;;  %v2142_v21 = vld [vmem:[%s6321_s8 + $0x18] sm:$0xff] }
  0x23   : > { %4403 = vmatprep.mubr.msk.f32.mxu1 %vm505_vm0, %v481_v22  ;;  %4371 = vmatprep.mubr.msk.f32.mxu0 %vm505_vm0, %v481_v22  ;;  %v2145_v22 = vld [vmem:[%s6322_s9 + $0x10] sm:$0xff] }
  0x26   : > { %4404 = vmatmul.mubr.msk.f32.gmra.mrb[10].mxu1 %vm505_vm0, %v482_v23  ;;  %4372 = vmatmul.mubr.msk.f32.gmra.mrb[10].mxu0 %vm505_vm0, %v482_v23  ;;  %v4832_v23 = vpack.c.bf16 %v2142_v21, %v2141_v20 }
  0x27   : > { %4406 = vmatprep.mubr.msk.f32.mxu1 %vm505_vm0, %v483_v24  ;;  %4374 = vmatprep.mubr.msk.f32.mxu0 %vm505_vm0, %v483_v24  ;;  %v2146_v24 = vld [vmem:[%s6322_s9 + $0x18] sm:$0xff] }
  0x2a   : > { %4407 = vmatmul.mubr.msk.f32.gmra.mrb[12].mxu1 %vm505_vm0, %v484_v25  ;;  %4375 = vmatmul.mubr.msk.f32.gmra.mrb[12].mxu0 %vm505_vm0, %v484_v25  ;;  %v4840_v25 = vpack.c.bf16 %v2146_v24, %v2145_v22 }
  0x2b   : > { %4409 = vmatprep.mubr.msk.f32.mxu1 %vm505_vm0, %v485_v26  ;;  %4377 = vmatprep.mubr.msk.f32.mxu0 %vm505_vm0, %v485_v26  ;;  %v5352_v26 = vld [vmem:[%s6317_s4 + $0x8] sm:$0xff] }
  0x2e   : > { %4410 = vmatmul.mubr.msk.f32.gmra.mrb[14].mxu1 %vm505_vm0, %v486_v27  ;;  %4378 = vmatmul.mubr.msk.f32.gmra.mrb[14].mxu0 %vm505_vm0, %v486_v27 }
  0x2f   : > { %4416 = vmatprep.mubr.msk.f32.mxu0 %vm886_vm1, %v5086_v28  ;;  %4435 = vmatprep.mubr.msk.f32.mxu1 %vm886_vm1, %v5086_v28 }
  0xe5   : > { %v4390_v29 = vpop.f32.mrb[0].mxu1  ;;  %v5092_v31 = vpop.f32.mrb[0].mxu0 }
  0xe6   : > { %v765_v30 = vpop.f32.mrb[1].mxu1  ;;  %v5094_v33 = vpop.f32.mrb[1].mxu0 }
  0xe7   : > { %v4796_v32 = vpack.c.bf16 %v4390_v29, %v765_v30  ;;  %v5362_v30 = vld [vmem:[%s6317_s4 + $0x18] sm:$0xff] }
  0xe9   : > { %v4393_v34 = vpop.f32.mrb[2].mxu1  ;;  %4797 = vmatprep.subr.bf16.mxu0 %v4796_v32  ;;  %v5101_v37 = vpop.f32.mrb[2].mxu0 }
  0xea   : > { %v775_v35 = vpop.f32.mrb[3].mxu1  ;;  %4799 = vmatpush3.bf16.msra.mxu0 %v4796_v32  ;;  %v5108_v40 = vpop.f32.mrb[3].mxu0 }
  0xeb   : > { %v4800_v38 = vpack.c.bf16 %v4393_v34, %v775_v35  ;;  %v5368_v34 = vld [vmem:[%s6317_s4 + $0x10] sm:$0xff] }
  0xed   : > { %4417 = vmatmul.mubr.msk.f32.vlgmr.msra.gmra.mrb[16].mxu0 %vm886_vm1, %v5099_v36  ;;  %4801 = vmatprep.subr.bf16.mxu1 %v4800_v38  ;;  %v4396_v41 = vpop.f32.mrb[4].mxu1  ;;  %v5119_v44 = vpop.f32.mrb[4].mxu0 }
  0xee   : > { %4803 = vmatpush3.bf16.msra.mxu1 %v4800_v38  ;;  %4419 = vmatprep.mubr.msk.f32.mxu0 %vm886_vm1, %v5106_v39  ;;  %v785_v43 = vpop.f32.mrb[5].mxu1  ;;  %v5126_v47 = vpop.f32.mrb[5].mxu0 }
  0xef   : > { %v4804_v46 = vpack.c.bf16 %v4396_v41, %v785_v43 }
  0xf1   : > { %4420 = vmatmul.mubr.msk.f32.gmra.mrb[18].mxu0 %vm886_vm1, %v5117_v42  ;;  %4436 = vmatmul.mubr.msk.f32.vlgmr.msra.gmra.mrb[16].mxu1 %vm886_vm1, %v5099_v36  ;;  %v4399_v48 = vpop.f32.mrb[6].mxu1  ;;  %v5141_v51 = vpop.f32.mrb[6].mxu0 }
  0xf2   : > { %4422 = vmatprep.mubr.msk.f32.mxu0 %vm886_vm1, %v5124_v45  ;;  %4438 = vmatprep.mubr.msk.f32.mxu1 %vm886_vm1, %v5106_v39  ;;  %v795_v50 = vpop.f32.mrb[7].mxu1  ;;  %v5148_v54 = vpop.f32.mrb[7].mxu0 }
  0xf3   : > { %4805 = vmatprep.subr.bf16.mxu0 %v4804_v46  ;;  %v4808_v53 = vpack.c.bf16 %v4399_v48, %v795_v50 }
  0xf4   : > { %4807 = vmatpush3.bf16.msra.mxu0 %v4804_v46 }
  0xf5   : > { %4423 = vmatmul.mubr.msk.f32.gmra.mrb[20].mxu0 %vm886_vm1, %v5139_v49  ;;  %4439 = vmatmul.mubr.msk.f32.gmra.mrb[18].mxu1 %vm886_vm1, %v5117_v42  ;;  %v4402_v55 = vpop.f32.mrb[8].mxu1  ;;  %v5163_v58 = vpop.f32.mrb[8].mxu0 }
  0xf6   : > { %4425 = vmatprep.mubr.msk.f32.mxu0 %vm886_vm1, %v5146_v52  ;;  %4441 = vmatprep.mubr.msk.f32.mxu1 %vm886_vm1, %v5124_v45  ;;  %v805_v57 = vpop.f32.mrb[9].mxu1  ;;  %v5170_v61 = vpop.f32.mrb[9].mxu0 }
  0xf7   : > { %4809 = vmatprep.subr.bf16.mxu1 %v4808_v53  ;;  %v4812_v60 = vpack.c.bf16 %v4402_v55, %v805_v57 }
  0xf8   : > { %4811 = vmatpush3.bf16.msra.mxu1 %v4808_v53 }
  0xf9   : > { %4426 = vmatmul.mubr.msk.f32.gmra.mrb[22].mxu0 %vm886_vm1, %v5161_v56  ;;  %4442 = vmatmul.mubr.msk.f32.gmra.mrb[20].mxu1 %vm886_vm1, %v5139_v49  ;;  %v4405_v62 = vpop.f32.mrb[10].mxu1  ;;  %v5185_v1 = vpop.f32.mrb[10].mxu0 }
  0xfa   : > { %4428 = vmatprep.mubr.msk.f32.mxu0 %vm886_vm1, %v5168_v59  ;;  %4444 = vmatprep.mubr.msk.f32.mxu1 %vm886_vm1, %v5146_v52  ;;  %v815_v0 = vpop.f32.mrb[11].mxu1  ;;  %v5187_v3 = vpop.f32.mrb[11].mxu0 }
  0xfb   : > { %4813 = vmatprep.subr.bf16.mxu0 %v4812_v60  ;;  %v4816_v2 = vpack.c.bf16 %v4405_v62, %v815_v0 }
  0xfd   : > { %4429 = vmatmul.mubr.msk.f32.gmra.mrb[24].mxu0 %vm886_vm1, %v5183_v63  ;;  %4445 = vmatmul.mubr.msk.f32.gmra.mrb[22].mxu1 %vm886_vm1, %v5161_v56  ;;  %v4408_v4 = vpop.f32.mrb[12].mxu1  ;;  %v5197_v6 = vpop.f32.mrb[12].mxu0 }
  0xfe   : > { %4447 = vmatprep.mubr.msk.f32.mxu1 %vm886_vm1, %v5168_v59  ;;  %4454 = vmatprep.mubr.msk.f32.mxu0 %vm886_vm1, %v5086_v28  ;;  %v825_v5 = vpop.f32.mrb[13].mxu1  ;;  %v5199_v8 = vpop.f32.mrb[13].mxu0 }
  0xff   : > { %4817 = vmatprep.subr.bf16.mxu1 %v4816_v2  ;;  %v4820_v7 = vpack.c.bf16 %v4408_v4, %v825_v5 }
 0x101   : > { %4448 = vmatmul.mubr.msk.f32.gmra.mrb[24].mxu1 %vm886_vm1, %v5183_v63  ;;  %4455 = vmatmul.mubr.msk.f32.vlgmr.msra.gmra.mrb[26].mxu0 %vm886_vm1, %v5099_v36  ;;  %v4411_v9 = vpop.f32.mrb[14].mxu1  ;;  %v5209_v11 = vpop.f32.mrb[14].mxu0 }
 0x102   : > { %4457 = vmatprep.mubr.msk.f32.mxu0 %vm886_vm1, %v5106_v39  ;;  %4473 = vmatprep.mubr.msk.f32.mxu1 %vm886_vm1, %v5086_v28  ;;  %v835_v10 = vpop.f32.mrb[15].mxu1  ;;  %v5211_v13 = vpop.f32.mrb[15].mxu0 }
 0x103   : > { %4815 = vmatpush3.bf16.msra.mxu0 %v4812_v60  ;;  %v4824_v12 = vpack.c.bf16 %v4411_v9, %v835_v10 }
 0x104   : > { %4821 = vmatprep.subr.bf16.mxu0 %v4820_v7 }
 0x105   : > { %4458 = vmatmul.mubr.msk.f32.gmra.mrb[28].mxu0 %vm886_vm1, %v5117_v42  ;;  %4474 = vmatmul.mubr.msk.f32.vlgmr.msra.gmra.mrb[26].mxu1 %vm886_vm1, %v5099_v36 }
 0x106   : > { %4460 = vmatprep.mubr.msk.f32.mxu0 %vm886_vm1, %v5124_v45  ;;  %4476 = vmatprep.mubr.msk.f32.mxu1 %vm886_vm1, %v5106_v39 }
 0x107   : > { %4819 = vmatpush3.bf16.msra.mxu1 %v4816_v2 }
 0x108   : > { %4825 = vmatprep.subr.bf16.mxu1 %v4824_v12 }
 0x109   : > { %4461 = vmatmul.mubr.msk.f32.gmra.mrb[30].mxu0 %vm886_vm1, %v5139_v49  ;;  %4477 = vmatmul.mubr.msk.f32.gmra.mrb[28].mxu1 %vm886_vm1, %v5117_v42 }
 0x10a   : > { %4463 = vmatprep.mubr.msk.f32.mxu0 %vm886_vm1, %v5146_v52  ;;  %4479 = vmatprep.mubr.msk.f32.mxu1 %vm886_vm1, %v5124_v45 }
 0x10d   : > { %4464 = vmatmul.mubr.msk.f32.gmra.mrb[32].mxu0 %vm886_vm1, %v5161_v56  ;;  %4480 = vmatmul.mubr.msk.f32.gmra.mrb[30].mxu1 %vm886_vm1, %v5139_v49 }
 0x10e   : > { %4466 = vmatprep.mubr.msk.f32.mxu0 %vm886_vm1, %v5168_v59  ;;  %4482 = vmatprep.mubr.msk.f32.mxu1 %vm886_vm1, %v5146_v52 }
 0x111   : > { %4467 = vmatmul.mubr.msk.f32.gmra.mrb[34].mxu0 %vm886_vm1, %v5183_v63  ;;  %4483 = vmatmul.mubr.msk.f32.gmra.mrb[32].mxu1 %vm886_vm1, %v5161_v56 }
 0x112   : > { %4485 = vmatprep.mubr.msk.f32.mxu1 %vm886_vm1, %v5168_v59  ;;  %4492 = vmatprep.mubr.msk.f32.mxu0 %vm886_vm1, %v5086_v28 }
 0x115   : > { %4486 = vmatmul.mubr.msk.f32.gmra.mrb[34].mxu1 %vm886_vm1, %v5183_v63  ;;  %4493 = vmatmul.mubr.msk.f32.vlgmr.msra.gmra.mrb[36].mxu0 %vm886_vm1, %v5099_v36 }
 0x116   : > { %4495 = vmatprep.mubr.msk.f32.mxu0 %vm886_vm1, %v5106_v39  ;;  %4511 = vmatprep.mubr.msk.f32.mxu1 %vm886_vm1, %v5086_v28 }
 0x117   : > { %4823 = vmatpush3.bf16.msra.mxu0 %v4820_v7  ;;  %v5396_v7 = vld [vmem:[%s6317_s4 + $0x38] sm:$0xff] }
 0x118   : > { %4829 = vmatprep.subr.bf16.mxu0 %v4828_v17 }
 0x119   : > { %4496 = vmatmul.mubr.msk.f32.gmra.mrb[38].mxu0 %vm886_vm1, %v5117_v42  ;;  %4512 = vmatmul.mubr.msk.f32.vlgmr.msra.gmra.mrb[36].mxu1 %vm886_vm1, %v5099_v36 }
 0x11a   : > { %4498 = vmatprep.mubr.msk.f32.mxu0 %vm886_vm1, %v5124_v45  ;;  %4514 = vmatprep.mubr.msk.f32.mxu1 %vm886_vm1, %v5106_v39 }
 0x11b   : > { %4827 = vmatpush3.bf16.msra.mxu1 %v4824_v12 }
 0x11c   : > { %4837 = vmatprep.subr.bf16.mxu1 %v4836_v19 }
 0x11d   : > { %4499 = vmatmul.mubr.msk.f32.gmra.mrb[40].mxu0 %vm886_vm1, %v5139_v49  ;;  %4515 = vmatmul.mubr.msk.f32.gmra.mrb[38].mxu1 %vm886_vm1, %v5117_v42 }
 0x11e   : > { %4501 = vmatprep.mubr.msk.f32.mxu0 %vm886_vm1, %v5146_v52  ;;  %4517 = vmatprep.mubr.msk.f32.mxu1 %vm886_vm1, %v5124_v45 }
 0x121   : > { %4502 = vmatmul.mubr.msk.f32.gmra.mrb[42].mxu0 %vm886_vm1, %v5161_v56  ;;  %4518 = vmatmul.mubr.msk.f32.gmra.mrb[40].mxu1 %vm886_vm1, %v5139_v49 }
 0x122   : > { %4504 = vmatprep.mubr.msk.f32.mxu0 %vm886_vm1, %v5168_v59  ;;  %4520 = vmatprep.mubr.msk.f32.mxu1 %vm886_vm1, %v5146_v52 }
 0x125   : > { %4505 = vmatmul.mubr.msk.f32.gmra.mrb[44].mxu0 %vm886_vm1, %v5183_v63  ;;  %4521 = vmatmul.mubr.msk.f32.gmra.mrb[42].mxu1 %vm886_vm1, %v5161_v56 }
 0x126   : > { %4523 = vmatprep.mubr.msk.f32.mxu1 %vm886_vm1, %v5168_v59  ;;  %4530 = vmatprep.mubr.msk.f32.mxu0 %vm886_vm1, %v5086_v28 }
 0x129   : > { %4524 = vmatmul.mubr.msk.f32.gmra.mrb[44].mxu1 %vm886_vm1, %v5183_v63  ;;  %4531 = vmatmul.mubr.msk.f32.vlgmr.msra.gmra.mrb[46].mxu0 %vm886_vm1, %v5099_v36 }
 0x12a   : > { %4533 = vmatprep.mubr.msk.f32.mxu0 %vm886_vm1, %v5106_v39  ;;  %4549 = vmatprep.mubr.msk.f32.mxu1 %vm886_vm1, %v5086_v28  ;;  %v5357_v28 = vld [vmem:[%s6317_s4] sm:$0xff] }
 0x12b   : > { %4831 = vmatpush3.bf16.msra.mxu0 %v4828_v17 }
 0x12c   : > { %4833 = vmatprep.subr.bf16.mxu0 %v4832_v23 }
 0x12d   : > { %4534 = vmatmul.mubr.msk.f32.gmra.mrb[48].mxu0 %vm886_vm1, %v5117_v42  ;;  %4550 = vmatmul.mubr.msk.f32.vlgmr.msra.gmra.mrb[46].mxu1 %vm886_vm1, %v5099_v36 }
 0x12e   : > { %4536 = vmatprep.mubr.msk.f32.mxu0 %vm886_vm1, %v5124_v45  ;;  %4552 = vmatprep.mubr.msk.f32.mxu1 %vm886_vm1, %v5106_v39 }
 0x12f   : > { %4839 = vmatpush3.bf16.msra.mxu1 %v4836_v19  ;;  %4835 = vmatpush3.bf16.msra.mxu0 %v4832_v23 }
 0x130   : > { %4841 = vmatprep.subr.bf16.mxu1 %v4840_v25 }
 0x131   : > { %4537 = vmatmul.mubr.msk.f32.gmra.mrb[50].mxu0 %vm886_vm1, %v5139_v49  ;;  %4553 = vmatmul.mubr.msk.f32.gmra.mrb[48].mxu1 %vm886_vm1, %v5117_v42 }
 0x132   : > { %4539 = vmatprep.mubr.msk.f32.mxu0 %vm886_vm1, %v5146_v52  ;;  %4555 = vmatprep.mubr.msk.f32.mxu1 %vm886_vm1, %v5124_v45  ;;  %v5376_v45 = vld [vmem:[%s6317_s4 + $0x28] sm:$0xff] }
 0x133   : > { %4843 = vmatpush3.bf16.msra.mxu1 %v4840_v25 }
 0x135   : > { %4540 = vmatmul.mubr.msk.f32.gmra.mrb[52].mxu0 %vm886_vm1, %v5161_v56  ;;  %4556 = vmatmul.mubr.msk.f32.gmra.mrb[50].mxu1 %vm886_vm1, %v5139_v49 }
 0x136   : > { %4542 = vmatprep.mubr.msk.f32.mxu0 %vm886_vm1, %v5168_v59  ;;  %4558 = vmatprep.mubr.msk.f32.mxu1 %vm886_vm1, %v5146_v52  ;;  %v5385_v52 = vld [vmem:[%s6317_s4 + $0x20] sm:$0xff] }
 0x139   : > { %4543 = vmatmul.mubr.msk.f32.gmra.mrb[54].mxu0 %vm886_vm1, %v5183_v63  ;;  %4559 = vmatmul.mubr.msk.f32.gmra.mrb[52].mxu1 %vm886_vm1, %v5161_v56 }
 0x13a   : > { %4561 = vmatprep.mubr.msk.f32.mxu1 %vm886_vm1, %v5168_v59 }
 0x13d   : > { %4562 = vmatmul.mubr.msk.f32.gmra.mrb[54].mxu1 %vm886_vm1, %v5183_v63 }
 0x1c0   : > { %v4418_v27 = vpop.f32.mrb[16].mxu0 }
 0x1c1   : > { %v983_v29 = vpop.f32.mrb[17].mxu0  ;;  %v1033_v32 = vmul.f32 %v4418_v27, %v5352_v26 }
 0x1c2   : > { %v1032_v35 = vmul.f32 %v983_v29, %v5357_v28 }
 0x1c3   : > { %v1051_v46 = vsel %vm505_vm0, %v1033_v32, 0.0 }
 0x1c4   : > { %v4421_v36 = vpop.f32.mrb[18].mxu0  ;;  %v4437_v38 = vpop.f32.mrb[16].mxu1  ;;  %v1042_v53 = vsel %vm505_vm0, %v1032_v35, 0.0 }
 0x1c5   : > { %v1035_v39 = vmul.f32 %v4421_v36, %v5362_v30  ;;  %v993_v41 = vpop.f32.mrb[19].mxu0  ;;  %v1126_v42 = vpop.f32.mrb[17].mxu1  ;;  %v1176_v49 = vmul.f32 %v4437_v38, %v5352_v26  ;;  %v5416_v36 = vld [vmem:[%s6317_s4 + $0x48] sm:$0xff] }
 0x1c6   : > { %v1034_v43 = vmul.f32 %v993_v41, %v5368_v34  ;;  %v1175_v50 = vmul.f32 %v1126_v42, %v5357_v28  ;;  %v5423_v41 = vld [vmem:[%s6317_s4 + $0x40] sm:$0xff]  ;;  %v845_v42 = vld [vmem:[%s6318_s5 + $0x8] sm:$0xff] }
 0x1c7   : > { %v1052_v48 = vsel %vm505_vm0, %v1035_v39, 0.0  ;;  %v1194_v9 = vsel %vm505_vm0, %v1176_v49, 0.0 }
 0x1c8   : > { %v1053_v55 = vadd.f32 %v1052_v48, %v1051_v46  ;;  %v1043_v56 = vsel %vm505_vm0, %v1034_v43, 0.0  ;;  %v4424_v57 = vpop.f32.mrb[20].mxu0  ;;  %v4440_v59 = vpop.f32.mrb[18].mxu1  ;;  %v1185_v10 = vsel %vm505_vm0, %v1175_v50, 0.0  ;;  %v844_v43 = vld [vmem:[%s6318_s5] sm:$0xff] }
 0x1c9   : > { %v1044_v60 = vadd.f32 %v1043_v56, %v1042_v53  ;;  %v1037_v62 = vmul.f32 %v4424_v57, %v5376_v45  ;;  %v1178_v63 = vmul.f32 %v4440_v59, %v5362_v30  ;;  %v1003_v0 = vpop.f32.mrb[21].mxu0  ;;  %v1136_v2 = vpop.f32.mrb[19].mxu1 }
 0x1ca   : > { %v1036_v4 = vmul.f32 %v1003_v0, %v5385_v52  ;;  %v1177_v5 = vmul.f32 %v1136_v2, %v5368_v34 }
 0x1cb   : > { %v1054_v12 = vsel %vm505_vm0, %v1037_v62, 0.0  ;;  %v1195_v14 = vsel %vm505_vm0, %v1178_v63, 0.0 }
 0x1cc   : > { %v1055_v16 = vadd.f32 %v1054_v12, %v1053_v55  ;;  %v1196_v17 = vadd.f32 %v1195_v14, %v1194_v9  ;;  %v1045_v18 = vsel %vm505_vm0, %v1036_v4, 0.0  ;;  %v1186_v19 = vsel %vm505_vm0, %v1177_v5, 0.0  ;;  %v4427_v20 = vpop.f32.mrb[22].mxu0  ;;  %v4443_v21 = vpop.f32.mrb[20].mxu1  ;;  %v847_v12 = vld [vmem:[%s6318_s5 + $0x18] sm:$0xff]  ;;  %v846_v14 = vld [vmem:[%s6318_s5 + $0x10] sm:$0xff] }
 0x1cd   : > { %v1046_v22 = vadd.f32 %v1045_v18, %v1044_v60  ;;  %v1187_v23 = vadd.f32 %v1186_v19, %v1185_v10  ;;  %v1039_v24 = vmul.f32 %v4427_v20, %v5396_v7  ;;  %v1180_v25 = vmul.f32 %v4443_v21, %v5376_v45  ;;  %v1013_v27 = vpop.f32.mrb[23].mxu0  ;;  %v1146_v29 = vpop.f32.mrb[21].mxu1  ;;  %v5452_v20 = vld [vmem:[%s6319_s6] ss:$0 sm:$0xff] }
 0x1ce   : > { %v1038_v32 = vmul.f32 %v1013_v27, %v5405_v15  ;;  %v1179_v35 = vmul.f32 %v1146_v29, %v5385_v52  ;;  %v861_v4 = vmul.f32 %v5092_v31, %v845_v42  ;;  %v860_v5 = vmul.f32 %v844_v43, %v5094_v33  ;;  %v5463_v42 = vld [vmem:[%s6320_s7] ss:$0 sm:$0xff] }
 0x1cf   : > { %v1056_v38 = vsel %vm505_vm0, %v1039_v24, 0.0  ;;  %v1197_v39 = vsel %vm505_vm0, %v1180_v25, 0.0 }
 0x1d0   : > { %v1057_v46 = vadd.f32 %v1056_v38, %v1055_v16  ;;  %v1198_v48 = vadd.f32 %v1197_v39, %v1196_v17  ;;  %v1047_v49 = vsel %vm505_vm0, %v1038_v32, 0.0  ;;  %v1188_v50 = vsel %vm505_vm0, %v1179_v35, 0.0  ;;  %v4430_v53 = vpop.f32.mrb[24].mxu0  ;;  %v4446_v55 = vpop.f32.mrb[22].mxu1 }
 0x1d1   : > { %v1048_v56 = vadd.f32 %v1047_v49, %v1046_v22  ;;  %v1189_v57 = vadd.f32 %v1188_v50, %v1187_v23  ;;  %v1041_v59 = vmul.f32 %v4430_v53, %v5416_v36  ;;  %v1182_v60 = vmul.f32 %v4446_v55, %v5396_v7  ;;  %v1023_v62 = vpop.f32.mrb[25].mxu0  ;;  %v1156_v63 = vpop.f32.mrb[23].mxu1 }
 0x1d2   : > { %v1040_v0 = vmul.f32 %v1023_v62, %v5423_v41  ;;  %v1181_v2 = vmul.f32 %v1156_v63, %v5405_v15  ;;  %v863_v38 = vmul.f32 %v5101_v37, %v847_v12  ;;  %v862_v39 = vmul.f32 %v846_v14, %v5108_v40 }
 0x1d3   : > { %v1058_v9 = vsel %vm505_vm0, %v1041_v59, 0.0  ;;  %v1199_v10 = vsel %vm505_vm0, %v1182_v60, 0.0 }
 0x1d4   : > { %v1059_v16 = vadd.f32 %v1058_v9, %v1057_v46  ;;  %v1200_v17 = vadd.f32 %v1199_v10, %v1198_v48  ;;  %v1049_v18 = vsel %vm505_vm0, %v1040_v0, 0.0  ;;  %v1190_v31 = vsel %vm505_vm0, %v1181_v2, 0.0  ;;  %v4449_v19 = vpop.f32.mrb[24].mxu1  ;;  %v4456_v33 = vpop.f32.mrb[26].mxu0 }
 0x1d5   : > { %v1050_v21 = vadd.f32 %v1049_v18, %v1048_v56  ;;  %v1191_v22 = vadd.f32 %v1190_v31, %v1189_v57  ;;  %v1184_v23 = vmul.f32 %v4449_v19, %v5416_v36  ;;  %v1166_v24 = vpop.f32.mrb[25].mxu1  ;;  %v1319_v25 = vmul.f32 %v4456_v33, %v5352_v26  ;;  %v1269_v27 = vpop.f32.mrb[27].mxu0 }
 0x1d6   : > { %v2062_v29 = vadd.f32 %v1059_v16, %v861_v4  ;;  %v1183_v32 = vmul.f32 %v1166_v24, %v5423_v41  ;;  %v1318_v35 = vmul.f32 %v1269_v27, %v5357_v28 }
 0x1d7   : > { %v2061_v43 = vadd.f32 %v1050_v21, %v860_v5  ;;  %v1201_v46 = vsel %vm505_vm0, %v1184_v23, 0.0  ;;  %v1337_v53 = vsel %vm505_vm0, %v1319_v25, 0.0 }
 0x1d8   : > { %v2085_v48 = vmul.f32 %v5452_v20, %v2062_v29  ;;  %v1202_v49 = vadd.f32 %v1201_v46, %v1200_v17  ;;  %v1192_v50 = vsel %vm505_vm0, %v1183_v32, 0.0  ;;  %v4459_v55 = vpop.f32.mrb[28].mxu0  ;;  %v4475_v56 = vpop.f32.mrb[26].mxu1  ;;  %v1328_v2 = vsel %vm505_vm0, %v1318_v35, 0.0 }
 0x1d9   : > { %v2084_v37 = vmul.f32 %v5452_v20, %v2061_v43  ;;  %v1193_v40 = vadd.f32 %v1192_v50, %v1191_v22  ;;  %v1321_v57 = vmul.f32 %v4459_v55, %v5362_v30  ;;  %v1279_v59 = vpop.f32.mrb[29].mxu0  ;;  %v1462_v60 = vmul.f32 %v4475_v56, %v5352_v26  ;;  %v1412_v62 = vpop.f32.mrb[27].mxu1 }
 0x1da   : > { %v2108_v63 = vadd.f32 %v5463_v42, %v2085_v48  ;;  %v2064_v0 = vadd.f32 %v1202_v49, %v863_v38  ;;  %v1320_v4 = vmul.f32 %v1279_v59, %v5368_v34  ;;  %v1461_v12 = vmul.f32 %v1412_v62, %v5357_v28 }
 0x1db   : > { %v2063_v5 = vadd.f32 %v1193_v40, %v862_v39  ;;  %v1338_v9 = vsel %vm505_vm0, %v1321_v57, 0.0  ;;  %v2107_v10 = vadd.f32 %v5463_v42, %v2084_v37  ;;  %v1480_v31 = vsel %vm505_vm0, %v1462_v60, 0.0 }
 0x1dc   : > { %v2087_v14 = vmul.f32 %v5452_v20, %v2064_v0  ;;  %v1339_v16 = vadd.f32 %v1338_v9, %v1337_v53  ;;  %v1329_v17 = vsel %vm505_vm0, %v1320_v4, 0.0  ;;  %v4462_v18 = vpop.f32.mrb[30].mxu0  ;;  %v4478_v19 = vpop.f32.mrb[28].mxu1  ;;  %v2124_v27 = vmax.f32 %v2108_v63, 0.0 }
 0x1dd   : > { %v2086_v33 = vmul.f32 %v5452_v20, %v2063_v5  ;;  %v1330_v21 = vadd.f32 %v1329_v17, %v1328_v2  ;;  %v2123_v22 = vmax.f32 %v2107_v10, 0.0  ;;  %v1323_v23 = vmul.f32 %v4462_v18, %v5376_v45  ;;  %v1289_v24 = vpop.f32.mrb[31].mxu0  ;;  %v1422_v25 = vpop.f32.mrb[29].mxu1  ;;  %v849_v10 = vld [vmem:[%s6318_s5 + $0x28] sm:$0xff] }
 0x1de   : > { %v1322_v29 = vmul.f32 %v1289_v24, %v5385_v52  ;;  %v1464_v32 = vmul.f32 %v4478_v19, %v5362_v30  ;;  %v1463_v35 = vmul.f32 %v1422_v25, %v5368_v34  ;;  %v1471_v39 = vsel %vm505_vm0, %v1461_v12, 0.0  ;;  %v848_v12 = vld [vmem:[%s6318_s5 + $0x20] sm:$0xff] }
 0x1df   : > { %4572 = vmatprep.mubr.msk.f32.mxu0 %vm505_vm0, %v2123_v22  ;;  %4604 = vmatprep.mubr.msk.f32.mxu1 %vm505_vm0, %v2123_v22  ;;  %v1340_v38 = vsel %vm505_vm0, %v1323_v23, 0.0  ;;  %v2109_v43 = vadd.f32 %v5463_v42, %v2086_v33  ;;  %v2110_v46 = vadd.f32 %v5463_v42, %v2087_v14 }
 0x1e0   : > { %v1341_v48 = vadd.f32 %v1340_v38, %v1339_v16  ;;  %4573 = vmatmul.mubr.msk.f32.vlgmr.msra.gmra.mrb[56].mxu0 %vm505_vm0, %v2124_v27  ;;  %4605 = vmatmul.mubr.msk.f32.vlgmr.msra.gmra.mrb[56].mxu1 %vm505_vm0, %v2124_v27  ;;  %v1331_v49 = vsel %vm505_vm0, %v1322_v29, 0.0  ;;  %v4465_v50 = vpop.f32.mrb[32].mxu0  ;;  %v1481_v53 = vsel %vm505_vm0, %v1464_v32, 0.0  ;;  %v1472_v55 = vsel %vm505_vm0, %v1463_v35, 0.0  ;;  %v4481_v56 = vpop.f32.mrb[30].mxu1 }
 0x1e1   : > { %v1332_v37 = vadd.f32 %v1331_v49, %v1330_v21  ;;  %v1325_v40 = vmul.f32 %v4465_v50, %v5396_v7  ;;  %v1482_v57 = vadd.f32 %v1481_v53, %v1480_v31  ;;  %v1299_v59 = vpop.f32.mrb[33].mxu0  ;;  %v1473_v60 = vadd.f32 %v1472_v55, %v1471_v39  ;;  %v1432_v62 = vpop.f32.mrb[31].mxu1 }
 0x1e2   : > { %v1324_v63 = vmul.f32 %v1299_v59, %v5405_v15  ;;  %v2125_v0 = vmax.f32 %v2109_v43, 0.0  ;;  %v1466_v2 = vmul.f32 %v4481_v56, %v5376_v45  ;;  %v2126_v5 = vmax.f32 %v2110_v46, 0.0  ;;  %v851_v43 = vld [vmem:[%s6318_s5 + $0x38] sm:$0xff] }
 0x1e3   : > { %v1342_v4 = vsel %vm505_vm0, %v1325_v40, 0.0  ;;  %v1465_v9 = vmul.f32 %v1432_v62, %v5385_v52  ;;  %v865_v35 = vmul.f32 %v5119_v44, %v849_v10  ;;  %v864_v38 = vmul.f32 %v848_v12, %v5126_v47  ;;  %v850_v44 = vld [vmem:[%s6318_s5 + $0x30] sm:$0xff] }
 0x1e4   : > { %v1343_v14 = vadd.f32 %v1342_v4, %v1341_v48  ;;  %v1333_v16 = vsel %vm505_vm0, %v1324_v63, 0.0  ;;  %4575 = vmatprep.mubr.msk.f32.mxu0 %vm505_vm0, %v2125_v0  ;;  %4607 = vmatprep.mubr.msk.f32.mxu1 %vm505_vm0, %v2125_v0  ;;  %v4468_v17 = vpop.f32.mrb[34].mxu0  ;;  %v1483_v18 = vsel %vm505_vm0, %v1466_v2, 0.0  ;;  %v4484_v31 = vpop.f32.mrb[32].mxu1  ;;  %v867_v0 = vmul.f32 %v5141_v51, %v851_v43 }
 0x1e5   : > { %v1334_v19 = vadd.f32 %v1333_v16, %v1332_v37  ;;  %v1327_v33 = vmul.f32 %v4468_v17, %v5416_v36  ;;  %v1484_v21 = vadd.f32 %v1483_v18, %v1482_v57  ;;  %4576 = vmatmul.mubr.msk.f32.gmra.mrb[58].mxu0 %vm505_vm0, %v2126_v5  ;;  %4608 = vmatmul.mubr.msk.f32.gmra.mrb[58].mxu1 %vm505_vm0, %v2126_v5  ;;  %v1309_v22 = vpop.f32.mrb[35].mxu0  ;;  %v1474_v23 = vsel %vm505_vm0, %v1465_v9, 0.0  ;;  %v1442_v24 = vpop.f32.mrb[33].mxu1 }
 0x1e6   : > { %v1326_v25 = vmul.f32 %v1309_v22, %v5423_v41  ;;  %v1475_v27 = vadd.f32 %v1474_v23, %v1473_v60  ;;  %v1468_v29 = vmul.f32 %v4484_v31, %v5396_v7  ;;  %v1467_v32 = vmul.f32 %v1442_v24, %v5405_v15 }
 0x1e7   : > { %v1344_v39 = vsel %vm505_vm0, %v1327_v33, 0.0  ;;  %v866_v9 = vmul.f32 %v850_v44, %v5148_v54 }
 0x1e8   : > { %v1345_v46 = vadd.f32 %v1344_v39, %v1343_v14  ;;  %v1335_v48 = vsel %vm505_vm0, %v1326_v25, 0.0  ;;  %v1485_v49 = vsel %vm505_vm0, %v1468_v29, 0.0  ;;  %v1476_v50 = vsel %vm505_vm0, %v1467_v32, 0.0  ;;  %v4487_v53 = vpop.f32.mrb[34].mxu1  ;;  %v4494_v55 = vpop.f32.mrb[36].mxu0 }
 0x1e9   : > { %v1336_v47 = vadd.f32 %v1335_v48, %v1334_v19  ;;  %v1486_v56 = vadd.f32 %v1485_v49, %v1484_v21  ;;  %v1477_v37 = vadd.f32 %v1476_v50, %v1475_v27  ;;  %v1470_v40 = vmul.f32 %v4487_v53, %v5416_v36  ;;  %v1452_v57 = vpop.f32.mrb[35].mxu1  ;;  %v1555_v59 = vpop.f32.mrb[37].mxu0 }
 0x1ea   : > { %v2066_v60 = vadd.f32 %v1345_v46, %v865_v35  ;;  %v1469_v62 = vmul.f32 %v1452_v57, %v5423_v41  ;;  %v1605_v63 = vmul.f32 %v4494_v55, %v5352_v26  ;;  %v1604_v5 = vmul.f32 %v1555_v59, %v5357_v28 }
 0x1eb   : > { %v2065_v2 = vadd.f32 %v1336_v47, %v864_v38  ;;  %v1487_v4 = vsel %vm505_vm0, %v1470_v40, 0.0 }
 0x1ec   : > { %v2089_v10 = vmul.f32 %v5452_v20, %v2066_v60  ;;  %v1488_v12 = vadd.f32 %v1487_v4, %v1486_v56  ;;  %v1478_v14 = vsel %vm505_vm0, %v1469_v62, 0.0  ;;  %v4497_v16 = vpop.f32.mrb[38].mxu0  ;;  %v4513_v17 = vpop.f32.mrb[36].mxu1  ;;  %v1623_v19 = vsel %vm505_vm0, %v1605_v63, 0.0 }
 0x1ed   : > { %v2088_v18 = vmul.f32 %v5452_v20, %v2065_v2  ;;  %v1479_v31 = vadd.f32 %v1478_v14, %v1477_v37  ;;  %v1607_v51 = vmul.f32 %v4497_v16, %v5362_v30  ;;  %v1565_v33 = vpop.f32.mrb[39].mxu0  ;;  %v1698_v21 = vpop.f32.mrb[37].mxu1  ;;  %v1748_v54 = vmul.f32 %v4513_v17, %v5352_v26 }
 0x1ee   : > { %v2068_v22 = vadd.f32 %v1488_v12, %v867_v0  ;;  %v1606_v23 = vmul.f32 %v1565_v33, %v5368_v34  ;;  %v2112_v24 = vadd.f32 %v5463_v42, %v2089_v10  ;;  %v1614_v27 = vsel %vm505_vm0, %v1604_v5, 0.0 }
 0x1ef   : > { %v2067_v25 = vadd.f32 %v1479_v31, %v866_v9  ;;  %v1624_v29 = vsel %vm505_vm0, %v1607_v51, 0.0  ;;  %v2111_v32 = vadd.f32 %v5463_v42, %v2088_v18  ;;  %v1747_v46 = vmul.f32 %v1698_v21, %v5357_v28 }
 0x1f0   : > { %v2091_v35 = vmul.f32 %v5452_v20, %v2068_v22  ;;  %v1625_v38 = vadd.f32 %v1624_v29, %v1623_v19  ;;  %v1615_v39 = vsel %vm505_vm0, %v1606_v23, 0.0  ;;  %v4500_v43 = vpop.f32.mrb[40].mxu0  ;;  %v4516_v48 = vpop.f32.mrb[38].mxu1  ;;  %v1766_v56 = vsel %vm505_vm0, %v1748_v54, 0.0 }
 0x1f1   : > { %v2090_v49 = vmul.f32 %v5452_v20, %v2067_v25  ;;  %v1616_v50 = vadd.f32 %v1615_v39, %v1614_v27  ;;  %v2127_v53 = vmax.f32 %v2111_v32, 0.0  ;;  %v1609_v55 = vmul.f32 %v4500_v43, %v5376_v45  ;;  %v1575_v44 = vpop.f32.mrb[41].mxu0  ;;  %v1708_v47 = vpop.f32.mrb[39].mxu1  ;;  %v852_v25 = vld [vmem:[%s6318_s5 + $0x40] sm:$0xff] }
 0x1f2   : > { %v2128_v37 = vmax.f32 %v2112_v24, 0.0  ;;  %v1608_v40 = vmul.f32 %v1575_v44, %v5385_v52  ;;  %v1750_v57 = vmul.f32 %v4516_v48, %v5362_v30  ;;  %v1749_v60 = vmul.f32 %v1708_v47, %v5368_v34  ;;  %v853_v24 = vld [vmem:[%s6318_s5 + $0x48] sm:$0xff] }
 0x1f3   : > { %4578 = vmatprep.mubr.msk.f32.mxu0 %vm505_vm0, %v2127_v53  ;;  %4610 = vmatprep.mubr.msk.f32.mxu1 %vm505_vm0, %v2127_v53  ;;  %v1626_v59 = vsel %vm505_vm0, %v1609_v55, 0.0  ;;  %v2113_v62 = vadd.f32 %v5463_v42, %v2090_v49  ;;  %v2114_v63 = vadd.f32 %v5463_v42, %v2091_v35  ;;  %v1757_v4 = vsel %vm505_vm0, %v1747_v46, 0.0 }
 0x1f4   : > { %v1627_v0 = vadd.f32 %v1626_v59, %v1625_v38  ;;  %4579 = vmatmul.mubr.msk.f32.gmra.mrb[60].mxu0 %vm505_vm0, %v2128_v37  ;;  %4611 = vmatmul.mubr.msk.f32.gmra.mrb[60].mxu1 %vm505_vm0, %v2128_v37  ;;  %v1617_v2 = vsel %vm505_vm0, %v1608_v40, 0.0  ;;  %v4503_v5 = vpop.f32.mrb[42].mxu0  ;;  %v1767_v9 = vsel %vm505_vm0, %v1750_v57, 0.0  ;;  %v4519_v10 = vpop.f32.mrb[40].mxu1  ;;  %v1758_v18 = vsel %vm505_vm0, %v1749_v60, 0.0  ;;  %v855_v40 = vld [vmem:[%s6318_s5 + $0x58] sm:$0xff] }
 0x1f5   : > { %v1618_v12 = vadd.f32 %v1617_v2, %v1616_v50  ;;  %v1611_v14 = vmul.f32 %v4503_v5, %v5396_v7  ;;  %v1768_v16 = vadd.f32 %v1767_v9, %v1766_v56  ;;  %v1585_v17 = vpop.f32.mrb[43].mxu0  ;;  %v1718_v31 = vpop.f32.mrb[41].mxu1  ;;  %v1759_v51 = vadd.f32 %v1758_v18, %v1757_v4  ;;  %v854_v59 = vld [vmem:[%s6318_s5 + $0x50] sm:$0xff] }
 0x1f6   : > { %v1610_v19 = vmul.f32 %v1585_v17, %v5405_v15  ;;  %v2129_v33 = vmax.f32 %v2113_v62, 0.0  ;;  %v1752_v21 = vmul.f32 %v4519_v10, %v5376_v45  ;;  %v2130_v23 = vmax.f32 %v2114_v63, 0.0 }
 0x1f7   : > { %v1628_v22 = vsel %vm505_vm0, %v1611_v14, 0.0  ;;  %v1751_v54 = vmul.f32 %v1718_v31, %v5385_v52  ;;  %v869_v56 = vmul.f32 %v5163_v58, %v853_v24  ;;  %v868_v37 = vmul.f32 %v852_v25, %v5170_v61 }
 0x1f8   : > { %v1629_v27 = vadd.f32 %v1628_v22, %v1627_v0  ;;  %v1619_v29 = vsel %vm505_vm0, %v1610_v19, 0.0  ;;  %4581 = vmatprep.mubr.msk.f32.mxu0 %vm505_vm0, %v2129_v33  ;;  %4613 = vmatprep.mubr.msk.f32.mxu1 %vm505_vm0, %v2129_v33  ;;  %v4506_v32 = vpop.f32.mrb[44].mxu0  ;;  %v1769_v35 = vsel %vm505_vm0, %v1752_v21, 0.0  ;;  %v4522_v38 = vpop.f32.mrb[42].mxu1  ;;  %v871_v18 = vmul.f32 %v5185_v1, %v855_v40 }
 0x1f9   : > { %v1620_v39 = vadd.f32 %v1619_v29, %v1618_v12  ;;  %v1613_v43 = vmul.f32 %v4506_v32, %v5416_v36  ;;  %v1770_v46 = vadd.f32 %v1769_v35, %v1768_v16  ;;  %4582 = vmatmul.mubr.msk.f32.gmra.mrb[62].mxu0 %vm505_vm0, %v2130_v23  ;;  %4614 = vmatmul.mubr.msk.f32.gmra.mrb[62].mxu1 %vm505_vm0, %v2130_v23  ;;  %v1595_v48 = vpop.f32.mrb[45].mxu0  ;;  %v1760_v49 = vsel %vm505_vm0, %v1751_v54, 0.0  ;;  %v1728_v50 = vpop.f32.mrb[43].mxu1 }
 0x1fa   : > { %v1612_v53 = vmul.f32 %v1595_v48, %v5423_v41  ;;  %v1761_v55 = vadd.f32 %v1760_v49, %v1759_v51  ;;  %v1754_v44 = vmul.f32 %v4522_v38, %v5396_v7  ;;  %v1753_v47 = vmul.f32 %v1728_v50, %v5405_v15 }
 0x1fb   : > { %v1630_v57 = vsel %vm505_vm0, %v1613_v43, 0.0  ;;  %v870_v31 = vmul.f32 %v854_v59, %v5187_v3 }
 0x1fc   : > { %v1631_v60 = vadd.f32 %v1630_v57, %v1629_v27  ;;  %v1621_v62 = vsel %vm505_vm0, %v1612_v53, 0.0  ;;  %v1771_v63 = vsel %vm505_vm0, %v1754_v44, 0.0  ;;  %v1762_v0 = vsel %vm505_vm0, %v1753_v47, 0.0  ;;  %v4525_v58 = vpop.f32.mrb[44].mxu1  ;;  %v4532_v2 = vpop.f32.mrb[46].mxu0 }
 0x1fd   : > { %v1622_v61 = vadd.f32 %v1621_v62, %v1620_v39  ;;  %v1772_v4 = vadd.f32 %v1771_v63, %v1770_v46  ;;  %v1763_v5 = vadd.f32 %v1762_v0, %v1761_v55  ;;  %v1756_v9 = vmul.f32 %v4525_v58, %v5416_v36  ;;  %v1738_v10 = vpop.f32.mrb[45].mxu1  ;;  %v1841_v12 = vpop.f32.mrb[47].mxu0 }
 0x1fe   : > { %v2070_v14 = vadd.f32 %v1631_v60, %v869_v56  ;;  %v1755_v16 = vmul.f32 %v1738_v10, %v5423_v41  ;;  %v1891_v17 = vmul.f32 %v4532_v2, %v5352_v26  ;;  %v1890_v23 = vmul.f32 %v1841_v12, %v5357_v28 }
 0x1ff   : > { %v2069_v19 = vadd.f32 %v1622_v61, %v868_v37  ;;  %v1773_v51 = vsel %vm505_vm0, %v1756_v9, 0.0 }
 0x200   : > { %v2093_v33 = vmul.f32 %v5452_v20, %v2070_v14  ;;  %v1774_v21 = vadd.f32 %v1773_v51, %v1772_v4  ;;  %v1764_v22 = vsel %vm505_vm0, %v1755_v16, 0.0  ;;  %v4535_v54 = vpop.f32.mrb[48].mxu0  ;;  %v4551_v24 = vpop.f32.mrb[46].mxu1  ;;  %v1909_v29 = vsel %vm505_vm0, %v1891_v17, 0.0 }
 0x201   : > { %v2092_v25 = vmul.f32 %v5452_v20, %v2069_v19  ;;  %v1765_v27 = vadd.f32 %v1764_v22, %v1763_v5  ;;  %v1893_v1 = vmul.f32 %v4535_v54, %v5362_v30  ;;  %v1851_v3 = vpop.f32.mrb[49].mxu0  ;;  %v1984_v32 = vpop.f32.mrb[47].mxu1  ;;  %v2034_v39 = vmul.f32 %v4551_v24, %v5352_v26 }
 0x202   : > { %v2072_v35 = vadd.f32 %v1774_v21, %v871_v18  ;;  %v1892_v38 = vmul.f32 %v1851_v3, %v5368_v34  ;;  %v2116_v43 = vadd.f32 %v5463_v42, %v2093_v33  ;;  %v2033_v50 = vmul.f32 %v1984_v32, %v5357_v28 }
 0x203   : > { %v2071_v46 = vadd.f32 %v1765_v27, %v870_v31  ;;  %v1910_v48 = vsel %vm505_vm0, %v1893_v1, 0.0  ;;  %v2115_v49 = vadd.f32 %v5463_v42, %v2092_v25  ;;  %v1900_v55 = vsel %vm505_vm0, %v1890_v23, 0.0  ;;  %v857_v27 = vld [vmem:[%s6318_s5 + $0x68] sm:$0xff] }
 0x204   : > { %v2095_v53 = vmul.f32 %v5452_v20, %v2072_v35  ;;  %v1911_v44 = vadd.f32 %v1910_v48, %v1909_v29  ;;  %v1901_v47 = vsel %vm505_vm0, %v1892_v38, 0.0  ;;  %v4538_v56 = vpop.f32.mrb[50].mxu0  ;;  %v4554_v37 = vpop.f32.mrb[48].mxu1  ;;  %v2052_v63 = vsel %vm505_vm0, %v2034_v39, 0.0  ;;  %v856_v29 = vld [vmem:[%s6318_s5 + $0x60] sm:$0xff] }
 0x205   : > { %v2094_v26 = vmul.f32 %v5452_v20, %v2071_v46  ;;  %v1902_v40 = vadd.f32 %v1901_v47, %v1900_v55  ;;  %v2131_v57 = vmax.f32 %v2115_v49, 0.0  ;;  %v1895_v59 = vmul.f32 %v4538_v56, %v5376_v45  ;;  %v1861_v60 = vpop.f32.mrb[51].mxu0  ;;  %v1994_v62 = vpop.f32.mrb[49].mxu1 }
 0x206   : > { %v2132_v28 = vmax.f32 %v2116_v43, 0.0  ;;  %v1894_v0 = vmul.f32 %v1861_v60, %v5385_v52  ;;  %v2036_v58 = vmul.f32 %v4554_v37, %v5362_v30  ;;  %v2035_v61 = vmul.f32 %v1994_v62, %v5368_v34 }
 0x207   : > { %4584 = vmatprep.mubr.msk.f32.mxu0 %vm505_vm0, %v2131_v57  ;;  %4616 = vmatprep.mubr.msk.f32.mxu1 %vm505_vm0, %v2131_v57  ;;  %v1912_v2 = vsel %vm505_vm0, %v1895_v59, 0.0  ;;  %v2117_v4 = vadd.f32 %v5463_v42, %v2094_v26  ;;  %v2118_v5 = vadd.f32 %v5463_v42, %v2095_v53  ;;  %v2043_v30 = vsel %vm505_vm0, %v2033_v50, 0.0 }
 0x208   : > { %v1913_v9 = vadd.f32 %v1912_v2, %v1911_v44  ;;  %4585 = vmatmul.mubr.msk.f32.gmra.mrb[64].mxu0 %vm505_vm0, %v2132_v28  ;;  %4617 = vmatmul.mubr.msk.f32.gmra.mrb[64].mxu1 %vm505_vm0, %v2132_v28  ;;  %v1903_v10 = vsel %vm505_vm0, %v1894_v0, 0.0  ;;  %v4541_v12 = vpop.f32.mrb[52].mxu0  ;;  %v2053_v14 = vsel %vm505_vm0, %v2036_v58, 0.0  ;;  %v4557_v16 = vpop.f32.mrb[50].mxu1  ;;  %v2044_v19 = vsel %vm505_vm0, %v2035_v61, 0.0 }
 0x209   : > { %v1904_v17 = vadd.f32 %v1903_v10, %v1902_v40  ;;  %v1897_v34 = vmul.f32 %v4541_v12, %v5396_v7  ;;  %v2054_v18 = vadd.f32 %v2053_v14, %v2052_v63  ;;  %v1871_v31 = vpop.f32.mrb[53].mxu0  ;;  %v2004_v51 = vpop.f32.mrb[51].mxu1  ;;  %v2045_v21 = vadd.f32 %v2044_v19, %v2043_v30  ;;  %v858_v63 = vld [vmem:[%s6318_s5 + $0x70] sm:$0xff] }
 0x20a   : > { %v1896_v33 = vmul.f32 %v1871_v31, %v5405_v15  ;;  %v2133_v22 = vmax.f32 %v2117_v4, 0.0  ;;  %v2038_v23 = vmul.f32 %v4557_v16, %v5376_v45  ;;  %v2134_v24 = vmax.f32 %v2118_v5, 0.0 }
 0x20b   : > { %v1914_v54 = vsel %vm505_vm0, %v1897_v34, 0.0  ;;  %v2037_v25 = vmul.f32 %v2004_v51, %v5385_v52  ;;  %v873_v44 = vmul.f32 %v5197_v6, %v857_v27  ;;  %v872_v47 = vmul.f32 %v856_v29, %v5199_v8 }
 0x20c   : > { %v1915_v1 = vadd.f32 %v1914_v54, %v1913_v9  ;;  %v1905_v3 = vsel %vm505_vm0, %v1896_v33, 0.0  ;;  %4587 = vmatprep.mubr.msk.f32.mxu0 %vm505_vm0, %v2133_v22  ;;  %4619 = vmatprep.mubr.msk.f32.mxu1 %vm505_vm0, %v2133_v22  ;;  %v4544_v45 = vpop.f32.mrb[54].mxu0  ;;  %v2055_v32 = vsel %vm505_vm0, %v2038_v23, 0.0  ;;  %v4560_v35 = vpop.f32.mrb[52].mxu1 }
 0x20d   : > { %v1906_v52 = vadd.f32 %v1905_v3, %v1904_v17  ;;  %v1899_v38 = vmul.f32 %v4544_v45, %v5416_v36  ;;  %v2056_v39 = vadd.f32 %v2055_v32, %v2054_v18  ;;  %4588 = vmatmul.mubr.msk.f32.gmra.mrb[66].mxu0 %vm505_vm0, %v2134_v24  ;;  %4620 = vmatmul.mubr.msk.f32.gmra.mrb[66].mxu1 %vm505_vm0, %v2134_v24  ;;  %v1881_v43 = vpop.f32.mrb[55].mxu0  ;;  %v2046_v46 = vsel %vm505_vm0, %v2037_v25, 0.0  ;;  %v2014_v48 = vpop.f32.mrb[53].mxu1  ;;  %v5724_v3 = vld [vmem:[%s6314_s1 + $0x10] sm:$0xff]  ;;  %v5731_v45 = vld [vmem:[%s6314_s1 + $0x18] sm:$0xff]  ;;  %v5740_v32 = vld [vmem:[%s6314_s1 + $0x20] sm:$0xff] }
 0x20e   : > { %v1898_v49 = vmul.f32 %v1881_v43, %v5423_v41  ;;  %v2047_v50 = vadd.f32 %v2046_v46, %v2045_v21  ;;  %v2040_v53 = vmul.f32 %v4560_v35, %v5396_v7  ;;  %v2039_v55 = vmul.f32 %v2014_v48, %v5405_v15  ;;  %v859_v7 = vld [vmem:[%s6318_s5 + $0x78] sm:$0xff]  ;;  %v5749_v35 = vld [vmem:[%s6314_s1 + $0x28] sm:$0xff] }
 0x20f   : > { %v1916_v56 = vsel %vm505_vm0, %v1899_v38, 0.0  ;;  %v875_v61 = vmul.f32 %v5209_v11, %v859_v7  ;;  %v5769_v43 = vld [vmem:[%s6314_s1 + $0x38] sm:$0xff] }
 0x210   : > { %v1917_v37 = vadd.f32 %v1916_v56, %v1915_v1  ;;  %v1907_v26 = vsel %vm505_vm0, %v1898_v49, 0.0  ;;  %v2057_v40 = vsel %vm505_vm0, %v2040_v53, 0.0  ;;  %v2048_v57 = vsel %vm505_vm0, %v2039_v55, 0.0  ;;  %v4563_v59 = vpop.f32.mrb[54].mxu1  ;;  %v5717_v1 = vld [vmem:[%s6314_s1 + $0x8] sm:$0xff]  ;;  %v5780_v49 = vld [vmem:[%s6314_s1 + $0x40] sm:$0xff] }
 0x211   : > { %v1908_v60 = vadd.f32 %v1907_v26, %v1906_v52  ;;  %v2058_v15 = vadd.f32 %v2057_v40, %v2056_v39  ;;  %v2049_v62 = vadd.f32 %v2048_v57, %v2047_v50  ;;  %v2042_v6 = vmul.f32 %v4563_v59, %v5416_v36  ;;  %v2024_v8 = vpop.f32.mrb[55].mxu1  ;;  %v5758_v52 = vld [vmem:[%s6314_s1 + $0x30] sm:$0xff]  ;;  %v5789_v53 = vld [vmem:[%s6314_s1 + $0x48] sm:$0xff] }
 0x212   : > { %v2074_v28 = vadd.f32 %v1917_v37, %v873_v44  ;;  %v2041_v0 = vmul.f32 %v2024_v8, %v5423_v41  ;;  %v874_v36 = vmul.f32 %v858_v63, %v5211_v13 }
 0x213   : > { %v2073_v58 = vadd.f32 %v1908_v60, %v872_v47  ;;  %v2059_v2 = vsel %vm505_vm0, %v2042_v6, 0.0 }
 0x214   : > { %v2097_v4 = vmul.f32 %v5452_v20, %v2074_v28  ;;  %v2060_v5 = vadd.f32 %v2059_v2, %v2058_v15  ;;  %v2050_v9 = vsel %vm505_vm0, %v2041_v0, 0.0 }
 0x215   : > { %v2096_v10 = vmul.f32 %v5452_v20, %v2073_v58  ;;  %v2051_v30 = vadd.f32 %v2050_v9, %v2049_v62 }
 0x216   : > { %v2076_v12 = vadd.f32 %v2060_v5, %v875_v61  ;;  %v2120_v14 = vadd.f32 %v5463_v42, %v2097_v4 }
 0x217   : > { %v2075_v16 = vadd.f32 %v2051_v30, %v874_v36  ;;  %v2119_v41 = vadd.f32 %v5463_v42, %v2096_v10  ;;  %v5942_v10 = vld [vmem:[%s6323_s10 + $0x8] sm:$0xff]  ;;  %v5947_v30 = vld [vmem:[%s6323_s10] sm:$0xff] }
 0x218   : > { %v2099_v17 = vmul.f32 %v5452_v20, %v2076_v12  ;;  %v2136_v18 = vmax.f32 %v2120_v14, 0.0 }
 0x219   : > { %v2098_v11 = vmul.f32 %v5452_v20, %v2075_v16  ;;  %v2135_v34 = vmax.f32 %v2119_v41, 0.0  ;;  %v5700_v20 = vld [vmem:[%s6314_s1] sm:$0xff] }
 0x21a   : > { %v2122_v31 = vadd.f32 %v5463_v42, %v2099_v17  ;;  %v5954_v17 = vld [vmem:[%s6323_s10 + $0x18] sm:$0xff] }
 0x21b   : > { %4590 = vmatprep.mubr.msk.f32.mxu0 %vm505_vm0, %v2135_v34  ;;  %4622 = vmatprep.mubr.msk.f32.mxu1 %vm505_vm0, %v2135_v34  ;;  %v2121_v13 = vadd.f32 %v5463_v42, %v2098_v11  ;;  %v5959_v11 = vld [vmem:[%s6323_s10 + $0x10] sm:$0xff] }
 0x21c   : > { %4591 = vmatmul.mubr.msk.f32.gmra.mrb[68].mxu0 %vm505_vm0, %v2136_v18  ;;  %4623 = vmatmul.mubr.msk.f32.gmra.mrb[68].mxu1 %vm505_vm0, %v2136_v18  ;;  %v2138_v51 = vmax.f32 %v2122_v31, 0.0 }
 0x21d   : > { %v2137_v19 = vmax.f32 %v2121_v13, 0.0 }
 0x21f   : > { %4593 = vmatprep.mubr.msk.f32.mxu0 %vm505_vm0, %v2137_v19  ;;  %4625 = vmatprep.mubr.msk.f32.mxu1 %vm505_vm0, %v2137_v19 }
 0x220   : > { %4594 = vmatmul.mubr.msk.f32.gmra.mrb[70].mxu0 %vm505_vm0, %v2138_v51  ;;  %4626 = vmatmul.mubr.msk.f32.gmra.mrb[70].mxu1 %vm505_vm0, %v2138_v51 }
 0x221   : > { %4632 = vmatprep.mubr.msk.f32.mxu0 %vm886_vm1, %v5700_v20  ;;  %4651 = vmatprep.mubr.msk.f32.mxu1 %vm886_vm1, %v5700_v20 }
 0x2b3   : > { %v5706_v42 = vpop.f32.mrb[56].mxu0  ;;  %v4606_v33 = vpop.f32.mrb[56].mxu1 }
 0x2b4   : > { %v5708_v21 = vpop.f32.mrb[57].mxu0  ;;  %v2406_v22 = vpop.f32.mrb[57].mxu1 }
 0x2b5   : > { %v4844_v23 = vpack.c.bf16 %v4606_v33, %v2406_v22  ;;  %v5968_v33 = vld [vmem:[%s6323_s10 + $0x28] sm:$0xff] }
 0x2b7   : > { %4845 = vmatprep.subr.bf16.mxu0 %v4844_v23 }
 0x2b8   : > { %v5710_v54 = vpop.f32.mrb[58].mxu0  ;;  %v4609_v24 = vpop.f32.mrb[58].mxu1  ;;  %4847 = vmatpush3.bf16.msra.mxu0 %v4844_v23 }
 0x2b9   : > { %v5712_v25 = vpop.f32.mrb[59].mxu0  ;;  %v2416_v27 = vpop.f32.mrb[59].mxu1 }
 0x2ba   : > { %v4848_v29 = vpack.c.bf16 %v4609_v24, %v2416_v27  ;;  %v5975_v27 = vld [vmem:[%s6323_s10 + $0x20] sm:$0xff] }
 0x2bb   : > { %4633 = vmatmul.mubr.msk.f32.vlgmr.msra.gmra.mrb[72].mxu0 %vm886_vm1, %v5717_v1 }
 0x2bc   : > { %4849 = vmatprep.subr.bf16.mxu1 %v4848_v29  ;;  %4635 = vmatprep.mubr.msk.f32.mxu0 %vm886_vm1, %v5724_v3 }
 0x2bd   : > { %4851 = vmatpush3.bf16.msra.mxu1 %v4848_v29 }
 0x2bf   : > { %4636 = vmatmul.mubr.msk.f32.gmra.mrb[74].mxu0 %vm886_vm1, %v5731_v45 }
 0x2c0   : > { %4652 = vmatmul.mubr.msk.f32.vlgmr.msra.gmra.mrb[72].mxu1 %vm886_vm1, %v5717_v1  ;;  %4638 = vmatprep.mubr.msk.f32.mxu0 %vm886_vm1, %v5740_v32 }
 0x2c1   : > { %4654 = vmatprep.mubr.msk.f32.mxu1 %vm886_vm1, %v5724_v3 }
 0x2c3   : > { %4639 = vmatmul.mubr.msk.f32.gmra.mrb[76].mxu0 %vm886_vm1, %v5749_v35 }
 0x2c4   : > { %4655 = vmatmul.mubr.msk.f32.gmra.mrb[74].mxu1 %vm886_vm1, %v5731_v45  ;;  %4641 = vmatprep.mubr.msk.f32.mxu0 %vm886_vm1, %v5758_v52 }
 0x2c5   : > { %4657 = vmatprep.mubr.msk.f32.mxu1 %vm886_vm1, %v5740_v32 }
 0x2c7   : > { %v5764_v38 = vpop.f32.mrb[60].mxu0  ;;  %v4612_v39 = vpop.f32.mrb[60].mxu1  ;;  %4642 = vmatmul.mubr.msk.f32.gmra.mrb[78].mxu0 %vm886_vm1, %v5769_v43 }
 0x2c8   : > { %4658 = vmatmul.mubr.msk.f32.gmra.mrb[76].mxu1 %vm886_vm1, %v5749_v35  ;;  %v5775_v46 = vpop.f32.mrb[61].mxu0  ;;  %v2426_v48 = vpop.f32.mrb[61].mxu1  ;;  %4644 = vmatprep.mubr.msk.f32.mxu0 %vm886_vm1, %v5780_v49 }
 0x2c9   : > { %v4852_v50 = vpack.c.bf16 %v4612_v39, %v2426_v48  ;;  %4660 = vmatprep.mubr.msk.f32.mxu1 %vm886_vm1, %v5758_v52  ;;  %v5984_v48 = vld [vmem:[%s6323_s10 + $0x38] sm:$0xff] }
 0x2cb   : > { %4645 = vmatmul.mubr.msk.f32.gmra.mrb[80].mxu0 %vm886_vm1, %v5789_v53  ;;  %4853 = vmatprep.subr.bf16.mxu0 %v4852_v50 }
 0x2cc   : > { %v5793_v55 = vpop.f32.mrb[62].mxu0  ;;  %v4615_v44 = vpop.f32.mrb[62].mxu1  ;;  %4661 = vmatmul.mubr.msk.f32.gmra.mrb[78].mxu1 %vm886_vm1, %v5769_v43  ;;  %4855 = vmatpush3.bf16.msra.mxu0 %v4852_v50 }
 0x2cd   : > { %v5797_v47 = vpop.f32.mrb[63].mxu0  ;;  %v2436_v56 = vpop.f32.mrb[63].mxu1  ;;  %4663 = vmatprep.mubr.msk.f32.mxu1 %vm886_vm1, %v5780_v49  ;;  %4670 = vmatprep.mubr.msk.f32.mxu0 %vm886_vm1, %v5700_v20 }
 0x2ce   : > { %v4856_v37 = vpack.c.bf16 %v4615_v44, %v2436_v56  ;;  %v5992_v56 = vld [vmem:[%s6323_s10 + $0x30] sm:$0xff] }
 0x2cf   : > { %4671 = vmatmul.mubr.msk.f32.vlgmr.msra.gmra.mrb[82].mxu0 %vm886_vm1, %v5717_v1 }
 0x2d0   : > { %4664 = vmatmul.mubr.msk.f32.gmra.mrb[80].mxu1 %vm886_vm1, %v5789_v53  ;;  %4857 = vmatprep.subr.bf16.mxu1 %v4856_v37 }
 0x2d1   : > { %4859 = vmatpush3.bf16.msra.mxu1 %v4856_v37  ;;  %4673 = vmatprep.mubr.msk.f32.mxu0 %vm886_vm1, %v5724_v3 }
 0x2d2   : > { %4689 = vmatprep.mubr.msk.f32.mxu1 %vm886_vm1, %v5700_v20 }
 0x2d3   : > { %4674 = vmatmul.mubr.msk.f32.gmra.mrb[84].mxu0 %vm886_vm1, %v5731_v45 }
 0x2d4   : > { %4690 = vmatmul.mubr.msk.f32.vlgmr.msra.gmra.mrb[82].mxu1 %vm886_vm1, %v5717_v1  ;;  %4676 = vmatprep.mubr.msk.f32.mxu0 %vm886_vm1, %v5740_v32 }
 0x2d5   : > { %4692 = vmatprep.mubr.msk.f32.mxu1 %vm886_vm1, %v5724_v3 }
 0x2d7   : > { %4677 = vmatmul.mubr.msk.f32.gmra.mrb[86].mxu0 %vm886_vm1, %v5749_v35 }
 0x2d8   : > { %4693 = vmatmul.mubr.msk.f32.gmra.mrb[84].mxu1 %vm886_vm1, %v5731_v45  ;;  %4679 = vmatprep.mubr.msk.f32.mxu0 %vm886_vm1, %v5758_v52 }
 0x2d9   : > { %4695 = vmatprep.mubr.msk.f32.mxu1 %vm886_vm1, %v5740_v32 }
 0x2db   : > { %v5827_v26 = vpop.f32.mrb[64].mxu0  ;;  %v4618_v40 = vpop.f32.mrb[64].mxu1  ;;  %4680 = vmatmul.mubr.msk.f32.gmra.mrb[88].mxu0 %vm886_vm1, %v5769_v43 }
 0x2dc   : > { %4696 = vmatmul.mubr.msk.f32.gmra.mrb[86].mxu1 %vm886_vm1, %v5749_v35  ;;  %v5833_v57 = vpop.f32.mrb[65].mxu0  ;;  %v2446_v59 = vpop.f32.mrb[65].mxu1  ;;  %4682 = vmatprep.mubr.msk.f32.mxu0 %vm886_vm1, %v5780_v49 }
 0x2dd   : > { %v4860_v7 = vpack.c.bf16 %v4618_v40, %v2446_v59  ;;  %4698 = vmatprep.mubr.msk.f32.mxu1 %vm886_vm1, %v5758_v52 }
 0x2df   : > { %4683 = vmatmul.mubr.msk.f32.gmra.mrb[90].mxu0 %vm886_vm1, %v5789_v53  ;;  %4861 = vmatprep.subr.bf16.mxu0 %v4860_v7 }
 0x2e0   : > { %v5841_v60 = vpop.f32.mrb[66].mxu0  ;;  %v4621_v15 = vpop.f32.mrb[66].mxu1  ;;  %4699 = vmatmul.mubr.msk.f32.gmra.mrb[88].mxu1 %vm886_vm1, %v5769_v43  ;;  %4863 = vmatpush3.bf16.msra.mxu0 %v4860_v7 }
 0x2e1   : > { %v5845_v62 = vpop.f32.mrb[67].mxu0  ;;  %v2456_v6 = vpop.f32.mrb[67].mxu1  ;;  %4701 = vmatprep.mubr.msk.f32.mxu1 %vm886_vm1, %v5780_v49  ;;  %4708 = vmatprep.mubr.msk.f32.mxu0 %vm886_vm1, %v5700_v20 }
 0x2e2   : > { %v4864_v8 = vpack.c.bf16 %v4621_v15, %v2456_v6 }
 0x2e3   : > { %4709 = vmatmul.mubr.msk.f32.vlgmr.msra.gmra.mrb[92].mxu0 %vm886_vm1, %v5717_v1 }
 0x2e4   : > { %4702 = vmatmul.mubr.msk.f32.gmra.mrb[90].mxu1 %vm886_vm1, %v5789_v53  ;;  %4865 = vmatprep.subr.bf16.mxu1 %v4864_v8 }
 0x2e5   : > { %4867 = vmatpush3.bf16.msra.mxu1 %v4864_v8  ;;  %4711 = vmatprep.mubr.msk.f32.mxu0 %vm886_vm1, %v5724_v3 }
 0x2e6   : > { %4727 = vmatprep.mubr.msk.f32.mxu1 %vm886_vm1, %v5700_v20 }
 0x2e7   : > { %4712 = vmatmul.mubr.msk.f32.gmra.mrb[94].mxu0 %vm886_vm1, %v5731_v45 }
 0x2e8   : > { %4728 = vmatmul.mubr.msk.f32.vlgmr.msra.gmra.mrb[92].mxu1 %vm886_vm1, %v5717_v1  ;;  %4714 = vmatprep.mubr.msk.f32.mxu0 %vm886_vm1, %v5740_v32 }
 0x2e9   : > { %4730 = vmatprep.mubr.msk.f32.mxu1 %vm886_vm1, %v5724_v3 }
 0x2eb   : > { %4715 = vmatmul.mubr.msk.f32.gmra.mrb[96].mxu0 %vm886_vm1, %v5749_v35 }
 0x2ec   : > { %4731 = vmatmul.mubr.msk.f32.gmra.mrb[94].mxu1 %vm886_vm1, %v5731_v45  ;;  %4717 = vmatprep.mubr.msk.f32.mxu0 %vm886_vm1, %v5758_v52 }
 0x2ed   : > { %4733 = vmatprep.mubr.msk.f32.mxu1 %vm886_vm1, %v5740_v32 }
 0x2ef   : > { %v5875_v63 = vpop.f32.mrb[68].mxu0  ;;  %v4624_v28 = vpop.f32.mrb[68].mxu1  ;;  %4718 = vmatmul.mubr.msk.f32.gmra.mrb[98].mxu0 %vm886_vm1, %v5769_v43 }
 0x2f0   : > { %4734 = vmatmul.mubr.msk.f32.gmra.mrb[96].mxu1 %vm886_vm1, %v5749_v35  ;;  %v5881_v0 = vpop.f32.mrb[69].mxu0  ;;  %v2466_v58 = vpop.f32.mrb[69].mxu1  ;;  %4720 = vmatprep.mubr.msk.f32.mxu0 %vm886_vm1, %v5780_v49 }
 0x2f1   : > { %v4868_v2 = vpack.c.bf16 %v4624_v28, %v2466_v58  ;;  %4736 = vmatprep.mubr.msk.f32.mxu1 %vm886_vm1, %v5758_v52 }
 0x2f3   : > { %v5887_v61 = vpop.f32.mrb[70].mxu0  ;;  %v4627_v4 = vpop.f32.mrb[70].mxu1  ;;  %4721 = vmatmul.mubr.msk.f32.gmra.mrb[100].mxu0 %vm886_vm1, %v5789_v53  ;;  %4869 = vmatprep.subr.bf16.mxu0 %v4868_v2 }
 0x2f4   : > { %4737 = vmatmul.mubr.msk.f32.gmra.mrb[98].mxu1 %vm886_vm1, %v5769_v43  ;;  %v5893_v5 = vpop.f32.mrb[71].mxu0  ;;  %v2476_v9 = vpop.f32.mrb[71].mxu1  ;;  %4871 = vmatpush3.bf16.msra.mxu0 %v4868_v2 }
 0x2f5   : > { %v4872_v36 = vpack.c.bf16 %v4627_v4, %v2476_v9  ;;  %4739 = vmatprep.mubr.msk.f32.mxu1 %vm886_vm1, %v5780_v49  ;;  %4746 = vmatprep.mubr.msk.f32.mxu0 %vm886_vm1, %v5700_v20 }
 0x2f7   : > { %4747 = vmatmul.mubr.msk.f32.vlgmr.msra.gmra.mrb[102].mxu0 %vm886_vm1, %v5717_v1  ;;  %4873 = vmatprep.subr.bf16.mxu1 %v4872_v36 }
 0x2f8   : > { %4740 = vmatmul.mubr.msk.f32.gmra.mrb[100].mxu1 %vm886_vm1, %v5789_v53  ;;  %4749 = vmatprep.mubr.msk.f32.mxu0 %vm886_vm1, %v5724_v3 }
 0x2f9   : > { %4875 = vmatpush3.bf16.msra.mxu1 %v4872_v36  ;;  %4765 = vmatprep.mubr.msk.f32.mxu1 %vm886_vm1, %v5700_v20 }
 0x2fb   : > { %4750 = vmatmul.mubr.msk.f32.gmra.mrb[104].mxu0 %vm886_vm1, %v5731_v45 }
 0x2fc   : > { %4766 = vmatmul.mubr.msk.f32.vlgmr.msra.gmra.mrb[102].mxu1 %vm886_vm1, %v5717_v1  ;;  %4752 = vmatprep.mubr.msk.f32.mxu0 %vm886_vm1, %v5740_v32 }
 0x2fd   : > { %4768 = vmatprep.mubr.msk.f32.mxu1 %vm886_vm1, %v5724_v3 }
 0x2ff   : > { %4753 = vmatmul.mubr.msk.f32.gmra.mrb[106].mxu0 %vm886_vm1, %v5749_v35 }
 0x300   : > { %4769 = vmatmul.mubr.msk.f32.gmra.mrb[104].mxu1 %vm886_vm1, %v5731_v45  ;;  %4755 = vmatprep.mubr.msk.f32.mxu0 %vm886_vm1, %v5758_v52 }
 0x301   : > { %4771 = vmatprep.mubr.msk.f32.mxu1 %vm886_vm1, %v5740_v32 }
 0x303   : > { %4756 = vmatmul.mubr.msk.f32.gmra.mrb[108].mxu0 %vm886_vm1, %v5769_v43 }
 0x304   : > { %4772 = vmatmul.mubr.msk.f32.gmra.mrb[106].mxu1 %vm886_vm1, %v5749_v35  ;;  %4758 = vmatprep.mubr.msk.f32.mxu0 %vm886_vm1, %v5780_v49 }
 0x305   : > { %4774 = vmatprep.mubr.msk.f32.mxu1 %vm886_vm1, %v5758_v52 }
 0x307   : > { %4759 = vmatmul.mubr.msk.f32.gmra.mrb[110].mxu0 %vm886_vm1, %v5789_v53 }
 0x308   : > { %4775 = vmatmul.mubr.msk.f32.gmra.mrb[108].mxu1 %vm886_vm1, %v5769_v43 }
 0x309   : > { %4777 = vmatprep.mubr.msk.f32.mxu1 %vm886_vm1, %v5780_v49 }
 0x30c   : > { %4778 = vmatmul.mubr.msk.f32.gmra.mrb[110].mxu1 %vm886_vm1, %v5789_v53 }
 0x38e   : > { %v4634_v12 = vpop.f32.mrb[72].mxu0 }
 0x38f   : > { %v2643_v14 = vmul.f32 %v4634_v12, %v5942_v10  ;;  %v2593_v16 = vpop.f32.mrb[73].mxu0 }
 0x390   : > { %v2642_v41 = vmul.f32 %v2593_v16, %v5947_v30 }
 0x391   : > { %v2661_v18 = vsel %vm505_vm0, %v2643_v14, 0.0  ;;  %v6004_v14 = vld [vmem:[%s6323_s10 + $0x48] sm:$0xff] }
 0x392   : > { %v4637_v34 = vpop.f32.mrb[74].mxu0  ;;  %v2652_v51 = vsel %vm505_vm0, %v2642_v41, 0.0 }
 0x393   : > { %v2645_v31 = vmul.f32 %v4637_v34, %v5954_v17  ;;  %v2603_v13 = vpop.f32.mrb[75].mxu0  ;;  %v4653_v19 = vpop.f32.mrb[72].mxu1 }
 0x394   : > { %v2644_v20 = vmul.f32 %v2603_v13, %v5959_v11  ;;  %v2736_v22 = vpop.f32.mrb[73].mxu1  ;;  %v2786_v24 = vmul.f32 %v4653_v19, %v5942_v10  ;;  %v2486_v13 = vld [vmem:[%s6324_s11 + $0x8] sm:$0xff] }
 0x395   : > { %v2662_v23 = vsel %vm505_vm0, %v2645_v31, 0.0  ;;  %v2785_v45 = vmul.f32 %v2736_v22, %v5947_v30 }
 0x396   : > { %v2663_v29 = vadd.f32 %v2662_v23, %v2661_v18  ;;  %v2653_v1 = vsel %vm505_vm0, %v2644_v20, 0.0  ;;  %v4640_v3 = vpop.f32.mrb[76].mxu0  ;;  %v2804_v44 = vsel %vm505_vm0, %v2786_v24, 0.0  ;;  %v6011_v18 = vld [vmem:[%s6323_s10 + $0x40] sm:$0xff] }
 0x397   : > { %v2654_v32 = vadd.f32 %v2653_v1, %v2652_v51  ;;  %v2647_v35 = vmul.f32 %v4640_v3, %v5968_v33  ;;  %v2613_v52 = vpop.f32.mrb[77].mxu0  ;;  %v4656_v39 = vpop.f32.mrb[74].mxu1  ;;  %v2795_v7 = vsel %vm505_vm0, %v2785_v45, 0.0  ;;  %v2485_v23 = vld [vmem:[%s6324_s11] sm:$0xff] }
 0x398   : > { %v2646_v43 = vmul.f32 %v2613_v52, %v5975_v27  ;;  %v2788_v49 = vmul.f32 %v4656_v39, %v5954_v17  ;;  %v2746_v50 = vpop.f32.mrb[75].mxu1 }
 0x399   : > { %v2664_v53 = vsel %vm505_vm0, %v2647_v35, 0.0  ;;  %v2787_v37 = vmul.f32 %v2746_v50, %v5959_v11 }
 0x39a   : > { %v2665_v40 = vadd.f32 %v2664_v53, %v2663_v29  ;;  %v2655_v59 = vsel %vm505_vm0, %v2646_v43, 0.0  ;;  %v4643_v15 = vpop.f32.mrb[78].mxu0  ;;  %v2805_v6 = vsel %vm505_vm0, %v2788_v49, 0.0  ;;  %v2502_v49 = vmul.f32 %v5706_v42, %v2486_v13  ;;  %v6052_v13 = vld [vmem:[%s6326_s13] ss:$0 sm:$0xff] }
 0x39b   : > { %v2656_v8 = vadd.f32 %v2655_v59, %v2654_v32  ;;  %v2649_v28 = vmul.f32 %v4643_v15, %v5984_v48  ;;  %v2806_v58 = vadd.f32 %v2805_v6, %v2804_v44  ;;  %v2623_v2 = vpop.f32.mrb[79].mxu0  ;;  %v2796_v4 = vsel %vm505_vm0, %v2787_v37, 0.0  ;;  %v4659_v9 = vpop.f32.mrb[76].mxu1  ;;  %v2488_v37 = vld [vmem:[%s6324_s11 + $0x18] sm:$0xff]  ;;  %v6041_v6 = vld [vmem:[%s6325_s12] ss:$0 sm:$0xff] }
 0x39c   : > { %v2648_v36 = vmul.f32 %v2623_v2, %v5992_v56  ;;  %v2797_v12 = vadd.f32 %v2796_v4, %v2795_v7  ;;  %v2790_v16 = vmul.f32 %v4659_v9, %v5968_v33  ;;  %v2756_v41 = vpop.f32.mrb[77].mxu1  ;;  %v2501_v44 = vmul.f32 %v2485_v23, %v5708_v21 }
 0x39d   : > { %v2666_v34 = vsel %vm505_vm0, %v2649_v28, 0.0  ;;  %v2789_v31 = vmul.f32 %v2756_v41, %v5975_v27 }
 0x39e   : > { %v2667_v19 = vadd.f32 %v2666_v34, %v2665_v40  ;;  %v2657_v51 = vsel %vm505_vm0, %v2648_v36, 0.0  ;;  %v4646_v20 = vpop.f32.mrb[80].mxu0  ;;  %v2807_v22 = vsel %vm505_vm0, %v2790_v16, 0.0  ;;  %v2487_v40 = vld [vmem:[%s6324_s11 + $0x10] sm:$0xff]  ;;  %v2504_v34 = vmul.f32 %v5710_v54, %v2488_v37 }
 0x39f   : > { %v2658_v24 = vadd.f32 %v2657_v51, %v2656_v8  ;;  %v2651_v29 = vmul.f32 %v4646_v20, %v6004_v14  ;;  %v2808_v1 = vadd.f32 %v2807_v22, %v2806_v58  ;;  %v2633_v3 = vpop.f32.mrb[81].mxu0  ;;  %v2798_v45 = vsel %vm505_vm0, %v2789_v31, 0.0  ;;  %v4662_v32 = vpop.f32.mrb[78].mxu1 }
 0x3a0   : > { %v2650_v35 = vmul.f32 %v2633_v3, %v6011_v18  ;;  %v2799_v52 = vadd.f32 %v2798_v45, %v2797_v12  ;;  %v2792_v39 = vmul.f32 %v4662_v32, %v5984_v48  ;;  %v2766_v43 = vpop.f32.mrb[79].mxu1  ;;  %v2503_v31 = vmul.f32 %v2487_v40, %v5712_v25 }
 0x3a1   : > { %v2668_v50 = vsel %vm505_vm0, %v2651_v29, 0.0  ;;  %v2791_v53 = vmul.f32 %v2766_v43, %v5992_v56 }
 0x3a2   : > { %v2669_v59 = vadd.f32 %v2668_v50, %v2667_v19  ;;  %v2659_v7 = vsel %vm505_vm0, %v2650_v35, 0.0  ;;  %v2809_v15 = vsel %vm505_vm0, %v2792_v39, 0.0  ;;  %v4672_v42 = vpop.f32.mrb[82].mxu0 }
 0x3a3   : > { %v2660_v21 = vadd.f32 %v2659_v7, %v2658_v24  ;;  %v2810_v8 = vadd.f32 %v2809_v15, %v2808_v1  ;;  %v2800_v28 = vsel %vm505_vm0, %v2791_v53, 0.0  ;;  %v4665_v58 = vpop.f32.mrb[80].mxu1  ;;  %v2929_v2 = vmul.f32 %v4672_v42, %v5942_v10  ;;  %v2879_v4 = vpop.f32.mrb[83].mxu0 }
 0x3a4   : > { %v3672_v9 = vadd.f32 %v2669_v59, %v2502_v49  ;;  %v2801_v36 = vadd.f32 %v2800_v28, %v2799_v52  ;;  %v2794_v12 = vmul.f32 %v4665_v58, %v6004_v14  ;;  %v2776_v16 = vpop.f32.mrb[81].mxu1  ;;  %v2928_v41 = vmul.f32 %v2879_v4, %v5947_v30 }
 0x3a5   : > { %v3671_v19 = vadd.f32 %v2660_v21, %v2501_v44  ;;  %v2793_v51 = vmul.f32 %v2776_v16, %v6011_v18  ;;  %v2947_v23 = vsel %vm505_vm0, %v2929_v2, 0.0 }
 0x3a6   : > { %v3695_v20 = vmul.f32 %v6041_v6, %v3672_v9  ;;  %v2811_v22 = vsel %vm505_vm0, %v2794_v12, 0.0  ;;  %v2938_v24 = vsel %vm505_vm0, %v2928_v41, 0.0  ;;  %v4675_v29 = vpop.f32.mrb[84].mxu0  ;;  %v4894_v9 = vld [vmem:[%s5033_s20 + $0x8] sm:$0xff] }
 0x3a7   : > { %v3694_v54 = vmul.f32 %v6041_v6, %v3671_v19  ;;  %v2812_v25 = vadd.f32 %v2811_v22, %v2810_v8  ;;  %v2802_v1 = vsel %vm505_vm0, %v2793_v51, 0.0  ;;  %v2931_v3 = vmul.f32 %v4675_v29, %v5954_v17  ;;  %v2889_v45 = vpop.f32.mrb[85].mxu0  ;;  %v4691_v32 = vpop.f32.mrb[82].mxu1 }
 0x3a8   : > { %v3718_v35 = vadd.f32 %v6052_v13, %v3695_v20  ;;  %v2803_v52 = vadd.f32 %v2802_v1, %v2801_v36  ;;  %v2930_v39 = vmul.f32 %v2889_v45, %v5959_v11  ;;  %v3072_v43 = vmul.f32 %v4691_v32, %v5942_v10  ;;  %v3022_v49 = vpop.f32.mrb[83].mxu1 }
 0x3a9   : > { %v3717_v50 = vadd.f32 %v6052_v13, %v3694_v54  ;;  %v3674_v53 = vadd.f32 %v2812_v25, %v2504_v34  ;;  %v2948_v44 = vsel %vm505_vm0, %v2931_v3, 0.0  ;;  %v3071_v37 = vmul.f32 %v3022_v49, %v5947_v30 }
 0x3aa   : > { %v3734_v40 = vmax.f32 %v3718_v35, 0.0  ;;  %v3673_v59 = vadd.f32 %v2803_v52, %v2503_v31  ;;  %v2949_v7 = vadd.f32 %v2948_v44, %v2947_v23  ;;  %v2939_v15 = vsel %vm505_vm0, %v2930_v39, 0.0  ;;  %v4678_v42 = vpop.f32.mrb[86].mxu0  ;;  %v4895_v31 = vld [vmem:[%s5033_s20] sm:$0xff]  ;;  %v2490_v44 = vld [vmem:[%s6324_s11 + $0x28] sm:$0xff] }
 0x3ab   : > { %v3733_v21 = vmax.f32 %v3717_v50, 0.0  ;;  %v3697_v8 = vmul.f32 %v6041_v6, %v3674_v53  ;;  %v2940_v28 = vadd.f32 %v2939_v15, %v2938_v24  ;;  %v2933_v58 = vmul.f32 %v4678_v42, %v5968_v33  ;;  %v2899_v2 = vpop.f32.mrb[87].mxu0  ;;  %v4694_v4 = vpop.f32.mrb[84].mxu1  ;;  %v2489_v42 = vld [vmem:[%s6324_s11 + $0x20] sm:$0xff] }
 0x3ac   : > { %v3750_v36 = vadd.f32 %v4894_v9, %v3734_v40  ;;  %v3696_v12 = vmul.f32 %v6041_v6, %v3673_v59  ;;  %v3090_v16 = vsel %vm505_vm0, %v3072_v43, 0.0  ;;  %v2932_v41 = vmul.f32 %v2899_v2, %v5975_v27  ;;  %v3032_v34 = vpop.f32.mrb[85].mxu1 }
 0x3ad   : > { %v3749_v19 = vadd.f32 %v4895_v31, %v3733_v21  ;;  %v3720_v51 = vadd.f32 %v6052_v13, %v3697_v8  ;;  %v2950_v20 = vsel %vm505_vm0, %v2933_v58, 0.0  ;;  %v3081_v22 = vsel %vm505_vm0, %v3071_v37, 0.0  ;;  %v4896_v37 = vld [vmem:[%s5033_s20 + $0x18] sm:$0xff]  ;;  %v4897_v21 = vld [vmem:[%s5033_s20 + $0x10] sm:$0xff] }
 0x3ae   : > { %3766 = vst.msk [vmem:[%s6074_s24 + $0x8] sm:$0xff] %vm505_vm0, %v3750_v36  ;;  %v3719_v23 = vadd.f32 %v6052_v13, %v3696_v12  ;;  %v2951_v24 = vadd.f32 %v2950_v20, %v2949_v7  ;;  %v2941_v29 = vsel %vm505_vm0, %v2932_v41, 0.0  ;;  %v4681_v54 = vpop.f32.mrb[88].mxu0  ;;  %v3074_v25 = vmul.f32 %v4694_v4, %v5954_v17 }
 0x3af   : > { %3765 = vst.msk [vmem:[%s6074_s24] sm:$0xff] %vm505_vm0, %v3749_v19  ;;  %v3736_v1 = vmax.f32 %v3720_v51, 0.0  ;;  %v2942_v3 = vadd.f32 %v2941_v29, %v2940_v28  ;;  %v2935_v45 = vmul.f32 %v4681_v54, %v5984_v48  ;;  %v2909_v32 = vpop.f32.mrb[89].mxu0  ;;  %v3073_v35 = vmul.f32 %v3032_v34, %v5959_v11  ;;  %v4697_v52 = vpop.f32.mrb[86].mxu1 }
 0x3b0   : > { %v3735_v39 = vmax.f32 %v3719_v23, 0.0  ;;  %v3091_v43 = vsel %vm505_vm0, %v3074_v25, 0.0  ;;  %v2934_v49 = vmul.f32 %v2909_v32, %v5992_v56  ;;  %v3076_v50 = vmul.f32 %v4697_v52, %v5968_v33  ;;  %v3042_v53 = vpop.f32.mrb[87].mxu1  ;;  %v2491_v25 = vld [vmem:[%s6324_s11 + $0x30] sm:$0xff] }
 0x3b1   : > { %v3752_v40 = vadd.f32 %v4896_v37, %v3736_v1  ;;  %v2952_v59 = vsel %vm505_vm0, %v2935_v45, 0.0  ;;  %v3092_v7 = vadd.f32 %v3091_v43, %v3090_v16  ;;  %v3082_v15 = vsel %vm505_vm0, %v3073_v35, 0.0 }
 0x3b2   : > { %v3751_v8 = vadd.f32 %v4897_v21, %v3735_v39  ;;  %v2953_v28 = vadd.f32 %v2952_v59, %v2951_v24  ;;  %v2943_v58 = vsel %vm505_vm0, %v2934_v49, 0.0  ;;  %v3083_v2 = vadd.f32 %v3082_v15, %v3081_v22  ;;  %v4684_v4 = vpop.f32.mrb[90].mxu0 }
 0x3b3   : > { %3768 = vst.msk [vmem:[%s6074_s24 + $0x18] sm:$0xff] %vm505_vm0, %v3752_v40  ;;  %v2944_v9 = vadd.f32 %v2943_v58, %v2942_v3  ;;  %v2937_v36 = vmul.f32 %v4684_v4, %v6004_v14  ;;  %v3093_v12 = vsel %vm505_vm0, %v3076_v50, 0.0  ;;  %v2919_v16 = vpop.f32.mrb[91].mxu0  ;;  %v3075_v41 = vmul.f32 %v3042_v53, %v5975_v27  ;;  %v4700_v34 = vpop.f32.mrb[88].mxu1 }
 0x3b4   : > { %v2506_v31 = vmul.f32 %v5764_v38, %v2490_v44  ;;  %3767 = vst.msk [vmem:[%s6074_s24 + $0x10] sm:$0xff] %vm505_vm0, %v3751_v8  ;;  %v3094_v19 = vadd.f32 %v3093_v12, %v3092_v7  ;;  %v2936_v51 = vmul.f32 %v2919_v16, %v6011_v18  ;;  %v3078_v20 = vmul.f32 %v4700_v34, %v5984_v48  ;;  %v3052_v22 = vpop.f32.mrb[89].mxu1  ;;  %v2492_v38 = vld [vmem:[%s6324_s11 + $0x38] sm:$0xff] }
 0x3b5   : > { %v2505_v23 = vmul.f32 %v2489_v42, %v5775_v46  ;;  %v2954_v24 = vsel %vm505_vm0, %v2937_v36, 0.0  ;;  %v3084_v29 = vsel %vm505_vm0, %v3075_v41, 0.0  ;;  %v3077_v54 = vmul.f32 %v3052_v22, %v5992_v56 }
 0x3b6   : > { %v2955_v1 = vadd.f32 %v2954_v24, %v2953_v28  ;;  %v2945_v3 = vsel %vm505_vm0, %v2936_v51, 0.0  ;;  %v3085_v45 = vadd.f32 %v3084_v29, %v3083_v2  ;;  %v3095_v46 = vsel %vm505_vm0, %v3078_v20, 0.0  ;;  %v4710_v32 = vpop.f32.mrb[92].mxu0 }
 0x3b7   : > { %v2946_v35 = vadd.f32 %v2945_v3, %v2944_v9  ;;  %v3096_v52 = vadd.f32 %v3095_v46, %v3094_v19  ;;  %v3086_v39 = vsel %vm505_vm0, %v3077_v54, 0.0  ;;  %v4703_v43 = vpop.f32.mrb[90].mxu1  ;;  %v3215_v49 = vmul.f32 %v4710_v32, %v5942_v10  ;;  %v3165_v50 = vpop.f32.mrb[93].mxu0 }
 0x3b8   : > { %v3676_v53 = vadd.f32 %v2955_v1, %v2506_v31  ;;  %v3087_v44 = vadd.f32 %v3086_v39, %v3085_v45  ;;  %v3080_v37 = vmul.f32 %v4703_v43, %v6004_v14  ;;  %v3062_v40 = vpop.f32.mrb[91].mxu1  ;;  %v3214_v59 = vmul.f32 %v3165_v50, %v5947_v30  ;;  %v4898_v39 = vld [vmem:[%s5033_s20 + $0x28] sm:$0xff] }
 0x3b9   : > { %v2508_v7 = vmul.f32 %v5793_v55, %v2492_v38  ;;  %v2507_v15 = vmul.f32 %v2491_v25, %v5797_v47  ;;  %v3675_v42 = vadd.f32 %v2946_v35, %v2505_v23  ;;  %v3079_v21 = vmul.f32 %v3062_v40, %v6011_v18 }
 0x3ba   : > { %v3699_v8 = vmul.f32 %v6041_v6, %v3676_v53  ;;  %v3097_v28 = vsel %vm505_vm0, %v3080_v37, 0.0  ;;  %v3233_v58 = vsel %vm505_vm0, %v3215_v49, 0.0  ;;  %v3224_v2 = vsel %vm505_vm0, %v3214_v59, 0.0  ;;  %v4713_v4 = vpop.f32.mrb[94].mxu0  ;;  %v4899_v37 = vld [vmem:[%s5033_s20 + $0x20] sm:$0xff] }
 0x3bb   : > { %v3698_v9 = vmul.f32 %v6041_v6, %v3675_v42  ;;  %v3098_v36 = vadd.f32 %v3097_v28, %v3096_v52  ;;  %v3088_v12 = vsel %vm505_vm0, %v3079_v21, 0.0  ;;  %v3217_v55 = vmul.f32 %v4713_v4, %v5954_v17  ;;  %v3175_v47 = vpop.f32.mrb[95].mxu0  ;;  %v4729_v16 = vpop.f32.mrb[92].mxu1 }
 0x3bc   : > { %v3722_v41 = vadd.f32 %v6052_v13, %v3699_v8  ;;  %v3089_v34 = vadd.f32 %v3088_v12, %v3087_v44  ;;  %v3216_v31 = vmul.f32 %v3175_v47, %v5959_v11  ;;  %v3358_v19 = vmul.f32 %v4729_v16, %v5942_v10  ;;  %v3308_v51 = vpop.f32.mrb[93].mxu1 }
 0x3bd   : > { %v3721_v20 = vadd.f32 %v6052_v13, %v3698_v9  ;;  %v3678_v22 = vadd.f32 %v3098_v36, %v2508_v7  ;;  %v3234_v23 = vsel %vm505_vm0, %v3217_v55, 0.0  ;;  %v3357_v24 = vmul.f32 %v3308_v51, %v5947_v30  ;;  %v4900_v51 = vld [vmem:[%s5033_s20 + $0x38] sm:$0xff] }
 0x3be   : > { %v3738_v29 = vmax.f32 %v3722_v41, 0.0  ;;  %v3677_v54 = vadd.f32 %v3089_v34, %v2507_v15  ;;  %v3235_v38 = vadd.f32 %v3234_v23, %v3233_v58  ;;  %v3225_v25 = vsel %vm505_vm0, %v3216_v31, 0.0  ;;  %v4716_v1 = vpop.f32.mrb[96].mxu0 }
 0x3bf   : > { %v3737_v3 = vmax.f32 %v3721_v20, 0.0  ;;  %v3701_v45 = vmul.f32 %v6041_v6, %v3678_v22  ;;  %v3226_v46 = vadd.f32 %v3225_v25, %v3224_v2  ;;  %v3219_v32 = vmul.f32 %v4716_v1, %v5968_v33  ;;  %v3185_v35 = vpop.f32.mrb[97].mxu0  ;;  %v4732_v52 = vpop.f32.mrb[94].mxu1 }
 0x3c0   : > { %v3754_v43 = vadd.f32 %v4898_v39, %v3738_v29  ;;  %v3700_v49 = vmul.f32 %v6041_v6, %v3677_v54  ;;  %v3376_v50 = vsel %vm505_vm0, %v3358_v19, 0.0  ;;  %v3218_v53 = vmul.f32 %v3185_v35, %v5975_v27  ;;  %v3318_v44 = vpop.f32.mrb[95].mxu1  ;;  %v2494_v19 = vld [vmem:[%s6324_s11 + $0x48] sm:$0xff]  ;;  %v2493_v29 = vld [vmem:[%s6324_s11 + $0x40] sm:$0xff]  ;;  %v4901_v54 = vld [vmem:[%s5033_s20 + $0x30] sm:$0xff] }
 0x3c1   : > { %v3753_v40 = vadd.f32 %v4899_v37, %v3737_v3  ;;  %v3724_v59 = vadd.f32 %v6052_v13, %v3701_v45  ;;  %v3236_v7 = vsel %vm505_vm0, %v3219_v32, 0.0  ;;  %v3367_v15 = vsel %vm505_vm0, %v3357_v24, 0.0 }
 0x3c2   : > { %3770 = vst.msk [vmem:[%s6074_s24 + $0x28] sm:$0xff] %vm505_vm0, %v3754_v43  ;;  %v3723_v42 = vadd.f32 %v6052_v13, %v3700_v49  ;;  %v3237_v21 = vadd.f32 %v3236_v7, %v3235_v38  ;;  %v3227_v8 = vsel %vm505_vm0, %v3218_v53, 0.0  ;;  %v4719_v28 = vpop.f32.mrb[98].mxu0  ;;  %v3360_v58 = vmul.f32 %v4732_v52, %v5954_v17 }
 0x3c3   : > { %3769 = vst.msk [vmem:[%s6074_s24 + $0x20] sm:$0xff] %vm505_vm0, %v3753_v40  ;;  %v3740_v2 = vmax.f32 %v3724_v59, 0.0  ;;  %v3228_v4 = vadd.f32 %v3227_v8, %v3226_v46  ;;  %v3221_v9 = vmul.f32 %v4719_v28, %v5984_v48  ;;  %v3195_v36 = vpop.f32.mrb[99].mxu0  ;;  %v3359_v12 = vmul.f32 %v3318_v44, %v5959_v11  ;;  %v4735_v55 = vpop.f32.mrb[96].mxu1 }
 0x3c4   : > { %v3739_v47 = vmax.f32 %v3723_v42, 0.0  ;;  %v3377_v16 = vsel %vm505_vm0, %v3360_v58, 0.0  ;;  %v3220_v41 = vmul.f32 %v3195_v36, %v5992_v56  ;;  %v3362_v34 = vmul.f32 %v4735_v55, %v5968_v33  ;;  %v3328_v31 = vpop.f32.mrb[97].mxu1  ;;  %v2495_v42 = vld [vmem:[%s6324_s11 + $0x50] sm:$0xff] }
 0x3c5   : > { %v3756_v20 = vadd.f32 %v4900_v51, %v3740_v2  ;;  %v3238_v22 = vsel %vm505_vm0, %v3221_v9, 0.0  ;;  %v3378_v23 = vadd.f32 %v3377_v16, %v3376_v50  ;;  %v3368_v24 = vsel %vm505_vm0, %v3359_v12, 0.0 }
 0x3c6   : > { %v3755_v38 = vadd.f32 %v4901_v54, %v3739_v47  ;;  %v3239_v25 = vadd.f32 %v3238_v22, %v3237_v21  ;;  %v3229_v1 = vsel %vm505_vm0, %v3220_v41, 0.0  ;;  %v3369_v3 = vadd.f32 %v3368_v24, %v3367_v15  ;;  %v4722_v45 = vpop.f32.mrb[100].mxu0 }
 0x3c7   : > { %3772 = vst.msk [vmem:[%s6074_s24 + $0x38] sm:$0xff] %vm505_vm0, %v3756_v20  ;;  %v3230_v46 = vadd.f32 %v3229_v1, %v3228_v4  ;;  %v3223_v32 = vmul.f32 %v4722_v45, %v6004_v14  ;;  %v3379_v35 = vsel %vm505_vm0, %v3362_v34, 0.0  ;;  %v3205_v52 = vpop.f32.mrb[101].mxu0  ;;  %v3361_v39 = vmul.f32 %v3328_v31, %v5975_v27  ;;  %v4738_v43 = vpop.f32.mrb[98].mxu1 }
 0x3c8   : > { %v2510_v49 = vmul.f32 %v5827_v26, %v2494_v19  ;;  %3771 = vst.msk [vmem:[%s6074_s24 + $0x30] sm:$0xff] %vm505_vm0, %v3755_v38  ;;  %v3380_v50 = vadd.f32 %v3379_v35, %v3378_v23  ;;  %v3222_v53 = vmul.f32 %v3205_v52, %v6011_v18  ;;  %v3364_v44 = vmul.f32 %v4738_v43, %v5984_v48  ;;  %v3338_v37 = vpop.f32.mrb[99].mxu1  ;;  %v2496_v26 = vld [vmem:[%s6324_s11 + $0x58] sm:$0xff] }
 0x3c9   : > { %v2509_v40 = vmul.f32 %v2493_v29, %v5833_v57  ;;  %v3240_v59 = vsel %vm505_vm0, %v3223_v32, 0.0  ;;  %v3370_v7 = vsel %vm505_vm0, %v3361_v39, 0.0  ;;  %v3363_v15 = vmul.f32 %v3338_v37, %v5992_v56 }
 0x3ca   : > { %v3241_v21 = vadd.f32 %v3240_v59, %v3239_v25  ;;  %v3231_v8 = vsel %vm505_vm0, %v3222_v53, 0.0  ;;  %v3371_v28 = vadd.f32 %v3370_v7, %v3369_v3  ;;  %v3381_v57 = vsel %vm505_vm0, %v3364_v44, 0.0  ;;  %v4748_v58 = vpop.f32.mrb[102].mxu0 }
 0x3cb   : > { %v3232_v2 = vadd.f32 %v3231_v8, %v3230_v46  ;;  %v3382_v4 = vadd.f32 %v3381_v57, %v3380_v50  ;;  %v3372_v9 = vsel %vm505_vm0, %v3363_v15, 0.0  ;;  %v4741_v36 = vpop.f32.mrb[100].mxu1  ;;  %v3501_v12 = vmul.f32 %v4748_v58, %v5942_v10  ;;  %v3451_v55 = vpop.f32.mrb[103].mxu0 }
 0x3cc   : > { %v3680_v47 = vadd.f32 %v3241_v21, %v2510_v49  ;;  %v3373_v16 = vadd.f32 %v3372_v9, %v3371_v28  ;;  %v3366_v41 = vmul.f32 %v4741_v36, %v6004_v14  ;;  %v3348_v34 = vpop.f32.mrb[101].mxu1  ;;  %v3500_v31 = vmul.f32 %v3451_v55, %v5947_v30  ;;  %v4902_v28 = vld [vmem:[%s5033_s20 + $0x48] sm:$0xff]  ;;  %v4903_v9 = vld [vmem:[%s5033_s20 + $0x40] sm:$0xff] }
 0x3cd   : > { %v2512_v19 = vmul.f32 %v5841_v60, %v2496_v26  ;;  %v2511_v51 = vmul.f32 %v2495_v42, %v5845_v62  ;;  %v3679_v20 = vadd.f32 %v3232_v2, %v2509_v40  ;;  %v3365_v22 = vmul.f32 %v3348_v34, %v6011_v18 }
 0x3ce   : > { %v3703_v23 = vmul.f32 %v6041_v6, %v3680_v47  ;;  %v3383_v24 = vsel %vm505_vm0, %v3366_v41, 0.0  ;;  %v3519_v29 = vsel %vm505_vm0, %v3501_v12, 0.0  ;;  %v3510_v54 = vsel %vm505_vm0, %v3500_v31, 0.0  ;;  %v4751_v38 = vpop.f32.mrb[104].mxu0 }
 0x3cf   : > { %v3702_v25 = vmul.f32 %v6041_v6, %v3679_v20  ;;  %v3384_v1 = vadd.f32 %v3383_v24, %v3382_v4  ;;  %v3374_v3 = vsel %vm505_vm0, %v3365_v22, 0.0  ;;  %v3503_v60 = vmul.f32 %v4751_v38, %v5954_v17  ;;  %v3461_v62 = vpop.f32.mrb[105].mxu0  ;;  %v4767_v45 = vpop.f32.mrb[102].mxu1 }
 0x3d0   : > { %v3726_v46 = vadd.f32 %v6052_v13, %v3703_v23  ;;  %v3375_v32 = vadd.f32 %v3374_v3, %v3373_v16  ;;  %v3502_v35 = vmul.f32 %v3461_v62, %v5959_v11  ;;  %v3644_v52 = vmul.f32 %v4767_v45, %v5942_v10  ;;  %v3594_v39 = vpop.f32.mrb[103].mxu1  ;;  %v4904_v3 = vld [vmem:[%s5033_s20 + $0x58] sm:$0xff] }
 0x3d1   : > { %v3725_v43 = vadd.f32 %v6052_v13, %v3702_v25  ;;  %v3682_v49 = vadd.f32 %v3384_v1, %v2512_v19  ;;  %v3520_v50 = vsel %vm505_vm0, %v3503_v60, 0.0  ;;  %v3643_v53 = vmul.f32 %v3594_v39, %v5947_v30 }
 0x3d2   : > { %v3742_v44 = vmax.f32 %v3726_v46, 0.0  ;;  %v3681_v37 = vadd.f32 %v3375_v32, %v2511_v51  ;;  %v3521_v40 = vadd.f32 %v3520_v50, %v3519_v29  ;;  %v3511_v59 = vsel %vm505_vm0, %v3502_v35, 0.0  ;;  %v4754_v7 = vpop.f32.mrb[106].mxu0  ;;  %v4905_v32 = vld [vmem:[%s5033_s20 + $0x50] sm:$0xff] }
 0x3d3   : > { %v3741_v15 = vmax.f32 %v3725_v43, 0.0  ;;  %v3705_v26 = vmul.f32 %v6041_v6, %v3682_v49  ;;  %v3512_v10 = vadd.f32 %v3511_v59, %v3510_v54  ;;  %v3505_v42 = vmul.f32 %v4754_v7, %v5968_v33  ;;  %v3471_v21 = vpop.f32.mrb[107].mxu0  ;;  %v4770_v8 = vpop.f32.mrb[104].mxu1  ;;  %v2497_v59 = vld [vmem:[%s6324_s11 + $0x60] sm:$0xff] }
 0x3d4   : > { %v3758_v57 = vadd.f32 %v4902_v28, %v3742_v44  ;;  %v3704_v30 = vmul.f32 %v6041_v6, %v3681_v37  ;;  %v3662_v58 = vsel %vm505_vm0, %v3644_v52, 0.0  ;;  %v3504_v2 = vmul.f32 %v3471_v21, %v5975_v27  ;;  %v3604_v4 = vpop.f32.mrb[105].mxu1 }
 0x3d5   : > { %v3757_v36 = vadd.f32 %v4903_v9, %v3741_v15  ;;  %v3728_v12 = vadd.f32 %v6052_v13, %v3705_v26  ;;  %v3522_v55 = vsel %vm505_vm0, %v3505_v42, 0.0  ;;  %v3653_v47 = vsel %vm505_vm0, %v3643_v53, 0.0 }
 0x3d6   : > { %3774 = vst.msk [vmem:[%s6074_s24 + $0x48] sm:$0xff] %vm505_vm0, %v3758_v57  ;;  %v3727_v16 = vadd.f32 %v6052_v13, %v3704_v30  ;;  %v3523_v41 = vadd.f32 %v3522_v55, %v3521_v40  ;;  %v3513_v34 = vsel %vm505_vm0, %v3504_v2, 0.0  ;;  %v4757_v31 = vpop.f32.mrb[108].mxu0  ;;  %v3646_v19 = vmul.f32 %v4770_v8, %v5954_v17 }
 0x3d7   : > { %3773 = vst.msk [vmem:[%s6074_s24 + $0x40] sm:$0xff] %vm505_vm0, %v3757_v36  ;;  %v3744_v51 = vmax.f32 %v3728_v12, 0.0  ;;  %v3514_v20 = vadd.f32 %v3513_v34, %v3512_v10  ;;  %v3507_v22 = vmul.f32 %v4757_v31, %v5984_v48  ;;  %v3481_v23 = vpop.f32.mrb[109].mxu0  ;;  %v3645_v24 = vmul.f32 %v3604_v4, %v5959_v11  ;;  %v4773_v29 = vpop.f32.mrb[106].mxu1  ;;  %v2498_v11 = vld [vmem:[%s6324_s11 + $0x68] sm:$0xff] }
 0x3d8   : > { %v3743_v54 = vmax.f32 %v3727_v16, 0.0  ;;  %v3663_v38 = vsel %vm505_vm0, %v3646_v19, 0.0  ;;  %v3506_v25 = vmul.f32 %v3481_v23, %v5992_v56  ;;  %v3648_v1 = vmul.f32 %v4773_v29, %v5968_v33  ;;  %v3614_v17 = vpop.f32.mrb[107].mxu1  ;;  %v2499_v16 = vld [vmem:[%s6324_s11 + $0x70] sm:$0xff] }
 0x3d9   : > { %v3760_v60 = vadd.f32 %v4904_v3, %v3744_v51  ;;  %v3524_v62 = vsel %vm505_vm0, %v3507_v22, 0.0  ;;  %v3664_v45 = vadd.f32 %v3663_v38, %v3662_v58  ;;  %v3654_v46 = vsel %vm505_vm0, %v3645_v24, 0.0  ;;  %v4907_v3 = vld [vmem:[%s5033_s20 + $0x60] sm:$0xff] }
 0x3da   : > { %v3759_v35 = vadd.f32 %v4905_v32, %v3743_v54  ;;  %v3525_v52 = vadd.f32 %v3524_v62, %v3523_v41  ;;  %v3515_v39 = vsel %vm505_vm0, %v3506_v25, 0.0  ;;  %v3655_v43 = vadd.f32 %v3654_v46, %v3653_v47  ;;  %v4760_v33 = vpop.f32.mrb[110].mxu0  ;;  %v4908_v32 = vld [vmem:[%s5033_s20 + $0x78] sm:$0xff] }
 0x3db   : > { %3776 = vst.msk [vmem:[%s6074_s24 + $0x58] sm:$0xff] %vm505_vm0, %v3760_v60  ;;  %v3516_v49 = vadd.f32 %v3515_v39, %v3514_v20  ;;  %v3509_v50 = vmul.f32 %v4760_v33, %v6004_v14  ;;  %v3665_v53 = vsel %vm505_vm0, %v3648_v1, 0.0  ;;  %v3491_v44 = vpop.f32.mrb[111].mxu0  ;;  %v3647_v37 = vmul.f32 %v3614_v17, %v5975_v27  ;;  %v4776_v40 = vpop.f32.mrb[108].mxu1  ;;  %v4906_v1 = vld [vmem:[%s5033_s20 + $0x68] sm:$0xff] }
 0x3dc   : > { %3775 = vst.msk [vmem:[%s6074_s24 + $0x50] sm:$0xff] %vm505_vm0, %v3759_v35  ;;  %v3666_v7 = vadd.f32 %v3665_v53, %v3664_v45  ;;  %v3508_v15 = vmul.f32 %v3491_v44, %v6011_v18  ;;  %v3650_v26 = vmul.f32 %v4776_v40, %v5984_v48  ;;  %v3624_v10 = vpop.f32.mrb[109].mxu1  ;;  %v2514_v42 = vmul.f32 %v5875_v63, %v2498_v11  ;;  %v2500_v63 = vld [vmem:[%s6324_s11 + $0x78] sm:$0xff] }
 0x3dd   : > { %v3526_v21 = vsel %vm505_vm0, %v3509_v50, 0.0  ;;  %v3656_v8 = vsel %vm505_vm0, %v3647_v37, 0.0  ;;  %v3649_v27 = vmul.f32 %v3624_v10, %v5992_v56  ;;  %v2513_v2 = vmul.f32 %v2497_v59, %v5881_v0 }
 0x3de   : > { %v3527_v28 = vadd.f32 %v3526_v21, %v3525_v52  ;;  %v3517_v57 = vsel %vm505_vm0, %v3508_v15, 0.0  ;;  %v3657_v30 = vadd.f32 %v3656_v8, %v3655_v43  ;;  %v3667_v58 = vsel %vm505_vm0, %v3650_v26, 0.0  ;;  %v4909_v52 = vld [vmem:[%s5033_s20 + $0x70] sm:$0xff] }
 0x3df   : > { %v3518_v4 = vadd.f32 %v3517_v57, %v3516_v49  ;;  %v3668_v9 = vadd.f32 %v3667_v58, %v3666_v7  ;;  %v3658_v48 = vsel %vm505_vm0, %v3649_v27, 0.0  ;;  %v4779_v36 = vpop.f32.mrb[110].mxu1  ;;  %v2516_v19 = vmul.f32 %v5887_v61, %v2500_v63 }
 0x3e0   : > { %v3684_v12 = vadd.f32 %v3527_v28, %v2514_v42  ;;  %v3659_v55 = vadd.f32 %v3658_v48, %v3657_v30  ;;  %v3652_v56 = vmul.f32 %v4779_v36, %v6004_v14  ;;  %v3634_v47 = vpop.f32.mrb[111].mxu1  ;;  %v2515_v22 = vmul.f32 %v2499_v16, %v5893_v5 }
 0x3e1   : > { %v3683_v41 = vadd.f32 %v3518_v4, %v2513_v2  ;;  %v3651_v0 = vmul.f32 %v3634_v47, %v6011_v18 }
 0x3e2   : > { %v3707_v34 = vmul.f32 %v6041_v6, %v3684_v12  ;;  %v3669_v31 = vsel %vm505_vm0, %v3652_v56, 0.0 }
 0x3e3   : > { %v3706_v51 = vmul.f32 %v6041_v6, %v3683_v41  ;;  %v3670_v20 = vadd.f32 %v3669_v31, %v3668_v9  ;;  %v3660_v14 = vsel %vm505_vm0, %v3651_v0, 0.0 }
 0x3e4   : > { %v3730_v23 = vadd.f32 %v6052_v13, %v3707_v34  ;;  %v3661_v18 = vadd.f32 %v3660_v14, %v3659_v55 }
 0x3e5   : > { %v3729_v24 = vadd.f32 %v6052_v13, %v3706_v51  ;;  %v3686_v29 = vadd.f32 %v3670_v20, %v2516_v19 }
 0x3e6   : > { %v3746_v54 = vmax.f32 %v3730_v23, 0.0  ;;  %v3685_v38 = vadd.f32 %v3661_v18, %v2515_v22 }
 0x3e7   : > { %v3745_v61 = vmax.f32 %v3729_v24, 0.0  ;;  %v3709_v25 = vmul.f32 %v6041_v6, %v3686_v29 }
 0x3e8   : > { %v3762_v17 = vadd.f32 %v4906_v1, %v3746_v54  ;;  %v3708_v5 = vmul.f32 %v6041_v6, %v3685_v38 }
 0x3e9   : > { %v3761_v60 = vadd.f32 %v4907_v3, %v3745_v61  ;;  %v3732_v62 = vadd.f32 %v6052_v13, %v3709_v25 }
 0x3ea   : > { %3778 = vst.msk [vmem:[%s6074_s24 + $0x68] sm:$0xff] %vm505_vm0, %v3762_v17  ;;  %v3731_v45 = vadd.f32 %v6052_v13, %v3708_v5 }
 0x3eb   : > { %3777 = vst.msk [vmem:[%s6074_s24 + $0x60] sm:$0xff] %vm505_vm0, %v3761_v60  ;;  %v3748_v46 = vmax.f32 %v3732_v62, 0.0 }
 0x3ec   : > { %v3747_v11 = vmax.f32 %v3731_v45, 0.0 }
 0x3ed   : > { %v3764_v35 = vadd.f32 %v4908_v32, %v3748_v46 }
 0x3ee   : > { %v3763_v39 = vadd.f32 %v4909_v52, %v3747_v11 }
 0x3ef   : > { %3780 = vst.msk [vmem:[%s6074_s24 + $0x78] sm:$0xff] %vm505_vm0, %v3764_v35 }
 0x3f0   : > { %3779 = vst.msk [vmem:[%s6074_s24 + $0x70] sm:$0xff] %vm505_vm0, %v3763_v39 }
 0x3f1 PF: > { %s24_s29 = sadd.s32 1, %s4916_s29  }
 0x3f2   : > { %p21_p4 = scmp.ge.s32.totalorder %s24_s29, 4  }
 0x3f4   :  { %23 = sbr.rel (!%p21_p4) target bundleno = 1 (0x1), region = 106 }

</bundles_post_ra>
